<compile_context>
chip_gen: v5e
topology: v5e:2x2
jax: 0.10.0
libtpu: 0.0.40
codegen_flags: <defaults>
</compile_context>

<pallas_src>
import math
import functools

import jax
import jax.numpy as jnp
from jax.experimental import pallas as pl
from jax.experimental.pallas import tpu as pltpu


# order of the per-layer weight arrays passed to the decoder kernel
LAYER_WEIGHT_ORDER = [
    "qkv_w", "qkv_b", "o_w", "o_b",
    "l1_w", "l1_b", "l2_w", "l2_b",
    "n1_g", "n1_b", "n2_g", "n2_b", "n3_g", "n3_b",
]

# Toy shapes use a few KiB of VMEM; at production sizes compute this from the
# block sizes (x2 for double buffering) and add headroom.
VMEM_LIMIT_BYTES = 32 * 1024 * 1024


def _layer_norm(x, g, b, eps=1e-5):
    mu = jnp.mean(x, axis=-1, keepdims=True)
    var = jnp.mean((x - mu) ** 2, axis=-1, keepdims=True)
    return (x - mu) * jax.lax.rsqrt(var + eps) * g + b


def decoder_stack_kernel(x_ref, pe_ref,
                         qkv_w_ref, qkv_b_ref, ow_ref, ob_ref,
                         l1w_ref, l1b_ref, l2w_ref, l2b_ref,
                         n1g_ref, n1b_ref, n2g_ref, n2b_ref, n3g_ref, n3b_ref,
                         o_ref, x_scr, *, n_head):
    """One (batch-block, layer) grid step.  grid = (B//BT, num_layers)."""
    l = pl.program_id(1)
    BT, S, D = x_scr.shape
    M = BT * S
    hd = D // n_head
    scale = 1.0 / math.sqrt(hd)

    # Layer 0: PositionalEncoding (x + pe[:, :B] quirk), dropout = identity.
    @pl.when(l == 0)
    def _():
        x_scr[...] = x_ref[...] + pe_ref[...]          # (BT,S,D) + (BT,1,D)

    x = x_scr[...].reshape(M, D)                       # f32, batch fused into M

    # Causal mask built in-kernel (saves HBM traffic and a double-buffered
    # (S,S) VMEM block).
    row = jax.lax.broadcasted_iota(jnp.int32, (S, S), 0)
    col = jax.lax.broadcasted_iota(jnp.int32, (S, S), 1)
    mask = jnp.where(col <= row, 0.0, -jnp.inf).astype(jnp.float32)

    # ---------------- self-attention (post-norm decoder layer) --------------
    xb = x.astype(jnp.bfloat16)
    qkv = jnp.dot(xb, qkv_w_ref[...], preferred_element_type=jnp.float32)
    qkv = qkv + qkv_b_ref[...]                         # (M, 3D) f32
    q = qkv[:, 0 * D:1 * D].reshape(BT, S, D).astype(jnp.bfloat16)
    k = qkv[:, 1 * D:2 * D].reshape(BT, S, D).astype(jnp.bfloat16)
    v = qkv[:, 2 * D:3 * D].reshape(BT, S, D).astype(jnp.bfloat16)

    attn = jnp.zeros((M, D), jnp.float32)
    for h in range(n_head):
        qh = q[:, :, h * hd:(h + 1) * hd]
        kh = k[:, :, h * hd:(h + 1) * hd]
        vh = v[:, :, h * hd:(h + 1) * hd]
        # batched over the fused batch dim (single leading batch dim).
        s = jnp.einsum('bqd,bkd->bqk', qh, kh,
                       preferred_element_type=jnp.float32) * scale
        s = s + mask[None, :, :]
        s = s - jnp.max(s, axis=-1, keepdims=True)
        p = jnp.exp(s)
        p = p * pl.reciprocal(jnp.sum(p, axis=-1, keepdims=True), approx=True)
        ctx = jnp.einsum('bqk,bkd->bqd', p.astype(jnp.bfloat16), vh,
                         preferred_element_type=jnp.float32)   # (BT,S,hd)
        # sum of per-head output projections == concat(heads) @ W_o,
        # without the lane-concatenate relayout.
        attn = attn + jnp.dot(ctx.reshape(M, hd).astype(jnp.bfloat16),
                              ow_ref[h * hd:(h + 1) * hd, :],
                              preferred_element_type=jnp.float32)
    attn = attn + ob_ref[...]

    x = _layer_norm(x + attn, n1g_ref[...], n1b_ref[...])

    # cross-attention skipped (memory=None in the reference); norm2 still runs
    x = _layer_norm(x, n2g_ref[...], n2b_ref[...])

    # ---------------- feed-forward (relu) -----------------------------------
    h1 = jnp.dot(x.astype(jnp.bfloat16), l1w_ref[...],
                 preferred_element_type=jnp.float32) + l1b_ref[...]
    h1 = jnp.maximum(h1, 0.0)
    ff = jnp.dot(h1.astype(jnp.bfloat16), l2w_ref[...],
                 preferred_element_type=jnp.float32) + l2b_ref[...]
    x = _layer_norm(x + ff, n3g_ref[...], n3b_ref[...])

    x_scr[...] = x.reshape(BT, S, D)

    @pl.when(l == pl.num_programs(1) - 1)
    def _():
        o_ref[...] = x_scr[...]


def vocab_proj_kernel(x_ref, w_ref, b_ref, o_ref):
    """Final projection, tiled over the (lane-dense, padded) vocab dim."""
    o_ref[...] = (jnp.dot(x_ref[...].astype(jnp.bfloat16), w_ref[...],
                          preferred_element_type=jnp.float32) + b_ref[...])


def make_pe_table(max_len, d_model):
    position = jnp.arange(max_len, dtype=jnp.float32)[:, None]
    div_term = jnp.exp(jnp.arange(0, d_model, 2, dtype=jnp.float32)
                       * -(math.log(10000.0) / d_model))
    pe = jnp.zeros((max_len, d_model), jnp.float32)
    pe = pe.at[:, 0::2].set(jnp.sin(position * div_term))
    pe = pe.at[:, 1::2].set(jnp.cos(position * div_term))
    return pe


def init_params(key, d_model, n_head, num_layers, d_ffn, vocab_size):
    keys = iter(jax.random.split(key, 16))

    def w(shape, scale=0.05):
        return (scale * jax.random.normal(next(keys), shape)).astype(jnp.float32)

    L, D, F, V = num_layers, d_model, d_ffn, vocab_size
    return {
        "qkv_w": w((L, 3 * D, D)),
        "qkv_b": w((L, 1, 3 * D)),
        "o_w":   w((L, D, D)),
        "o_b":   w((L, 1, D)),
        "l1_w":  w((L, F, D)),
        "l1_b":  w((L, 1, F)),
        "l2_w":  w((L, D, F)),
        "l2_b":  w((L, 1, D)),
        "n1_g":  jnp.ones((L, 1, D), jnp.float32),
        "n1_b":  jnp.zeros((L, 1, D), jnp.float32),
        "n2_g":  jnp.ones((L, 1, D), jnp.float32),
        "n2_b":  jnp.zeros((L, 1, D), jnp.float32),
        "n3_g":  jnp.ones((L, 1, D), jnp.float32),
        "n3_b":  jnp.zeros((L, 1, D), jnp.float32),
        "out_w": w((V, D)),
        "out_b": w((1, V)),
    }


def prepare_weights(params, lane=128):
    """Pre-transpose weights to (in, out) layout (no in-kernel .T), cast matmul
    weights to bf16 for the MXU, and pad the vocab projection to a lane-dense
    multiple of 128."""
    t = lambda w: jnp.transpose(w, (0, 2, 1))
    V, D = params["out_w"].shape
    Vp = ((V + lane - 1) // lane) * lane
    out_w_p = jnp.zeros((D, Vp), jnp.bfloat16).at[:, :V].set(
        params["out_w"].T.astype(jnp.bfloat16))
    out_b_p = jnp.zeros((1, Vp), jnp.float32).at[:, :V].set(params["out_b"])
    return {
        "qkv_w": t(params["qkv_w"]).astype(jnp.bfloat16),   # (L, D, 3D)
        "qkv_b": params["qkv_b"],
        "o_w":   t(params["o_w"]).astype(jnp.bfloat16),     # (L, D, D): rows = ctx dim
        "o_b":   params["o_b"],
        "l1_w":  t(params["l1_w"]).astype(jnp.bfloat16),    # (L, D, F)
        "l1_b":  params["l1_b"],
        "l2_w":  t(params["l2_w"]).astype(jnp.bfloat16),    # (L, F, D)
        "l2_b":  params["l2_b"],
        "n1_g": params["n1_g"], "n1_b": params["n1_b"],
        "n2_g": params["n2_g"], "n2_b": params["n2_b"],
        "n3_g": params["n3_g"], "n3_b": params["n3_b"],
        "out_w": out_w_p, "out_b": out_b_p,
    }


def _pick_batch_tile(B, S, target_rows=256):
    # Fuse enough batch elements per block that the matmul M dim approaches the
    # MXU row count.  Note: on v7x (2 TensorCores) prefer >=2 batch blocks when
    # B allows so both cores get work; with tiny toy B we take one block.
    want = max(1, target_rows // max(S, 1))
    best = 1
    for cand in range(1, B + 1):
        if B % cand == 0 and cand <= want:
            best = cand
    return best


def autoregressive_transformer_forward(src, params, pe_table, *,
                                       n_head, num_layers):
    """src: (S, B, d_model) float32. Returns logits (S, B, vocab_size) f32."""
    S, B, D = src.shape
    V = params["out_w"].shape[0]
    prepped = prepare_weights(params)
    Vp = prepped["out_w"].shape[1]

    x_bsd = jnp.transpose(src, (1, 0, 2))             # (B, S, D)
    pe_b = pe_table[:B][:, None, :]                   # (B, 1, D) == pe[:, :x.size(1)]

    BT = _pick_batch_tile(B, S)
    grid_b = B // BT
    layer_weights = [prepped[k] for k in LAYER_WEIGHT_ORDER]

    def layer_spec(arr):
        # stream one layer's slice per grid step along the "arbitrary" axis
        return pl.BlockSpec((None,) + arr.shape[1:], lambda b, l: (l, 0, 0))

    dec = pl.pallas_call(
        functools.partial(decoder_stack_kernel, n_head=n_head),
        out_shape=jax.ShapeDtypeStruct((B, S, D), jnp.float32),
        grid=(grid_b, num_layers),
        in_specs=[pl.BlockSpec((BT, S, D), lambda b, l: (b, 0, 0)),
                  pl.BlockSpec((BT, 1, D), lambda b, l: (b, 0, 0))]
                 + [layer_spec(wt) for wt in layer_weights],
        out_specs=pl.BlockSpec((BT, S, D), lambda b, l: (b, 0, 0)),
        scratch_shapes=[pltpu.VMEM((BT, S, D), jnp.float32)],
        compiler_params=pltpu.CompilerParams(
            dimension_semantics=("parallel", "arbitrary"),
            vmem_limit_bytes=VMEM_LIMIT_BYTES),
    )(x_bsd, pe_b, *layer_weights)

    # ---- final vocab projection: lane-dense padded output, tiled over V ----
    M = B * S
    x_flat = dec.reshape(M, D)
    TV = next(t for t in (1024, 512, 256, 128) if Vp % t == 0)

    logits_p = pl.pallas_call(
        vocab_proj_kernel,
        out_shape=jax.ShapeDtypeStruct((M, Vp), jnp.float32),
        grid=(Vp // TV,),
        in_specs=[pl.BlockSpec((M, D), lambda j: (0, 0)),
                  pl.BlockSpec((D, TV), lambda j: (0, j)),
                  pl.BlockSpec((1, TV), lambda j: (0, j))],
        out_specs=pl.BlockSpec((M, TV), lambda j: (0, j)),
        compiler_params=pltpu.CompilerParams(
            dimension_semantics=("parallel",),
            vmem_limit_bytes=VMEM_LIMIT_BYTES),
    )(x_flat, prepped["out_w"], prepped["out_b"])

    logits = logits_p[:, :V].reshape(B, S, V)
    return jnp.transpose(logits, (1, 0, 2))            # back to (S, B, V)


if __name__ == "__main__":
    d_model, n_head, num_layers, d_ffn, max_seq_len, vocab_size = 32, 4, 2, 64, 16, 48
    S, B = 8, 2

    key = jax.random.PRNGKey(0)
    k_src, k_par = jax.random.split(key)

    src = jax.random.normal(k_src, (S, B, d_model), dtype=jnp.float32)
    params = init_params(k_par, d_model, n_head, num_layers, d_ffn, vocab_size)
    pe_table = make_pe_table(max_seq_len, d_model)

    out = autoregressive_transformer_forward(
        src, params, pe_table, n_head=n_head, num_layers=num_layers)
    out = jax.block_until_ready(out)

    assert out.shape == (S, B, vocab_size), out.shape
    assert bool(jnp.all(jnp.isfinite(out)))
    print("KERNEL_OK")
</pallas_src>

<mosaic_0001>
module attributes {stable_mosaic.version = 11 : i64} {
  func.func @decoder_stack_kernel(%arg0: i32, %arg1: i32, %arg2: memref<2x8x32xf32, #tpu.memory_space<vmem>>, %arg3: memref<2x1x32xf32, #tpu.memory_space<vmem>>, %arg4: memref<1x32x96xbf16, #tpu.memory_space<vmem>>, %arg5: memref<1x1x96xf32, #tpu.memory_space<vmem>>, %arg6: memref<1x32x32xbf16, #tpu.memory_space<vmem>>, %arg7: memref<1x1x32xf32, #tpu.memory_space<vmem>>, %arg8: memref<1x32x64xbf16, #tpu.memory_space<vmem>>, %arg9: memref<1x1x64xf32, #tpu.memory_space<vmem>>, %arg10: memref<1x64x32xbf16, #tpu.memory_space<vmem>>, %arg11: memref<1x1x32xf32, #tpu.memory_space<vmem>>, %arg12: memref<1x1x32xf32, #tpu.memory_space<vmem>>, %arg13: memref<1x1x32xf32, #tpu.memory_space<vmem>>, %arg14: memref<1x1x32xf32, #tpu.memory_space<vmem>>, %arg15: memref<1x1x32xf32, #tpu.memory_space<vmem>>, %arg16: memref<1x1x32xf32, #tpu.memory_space<vmem>>, %arg17: memref<1x1x32xf32, #tpu.memory_space<vmem>>, %arg18: memref<2x8x32xf32, #tpu.memory_space<vmem>>, %arg19: memref<2x8x32xf32, #tpu.memory_space<vmem>>) attributes {dimension_semantics = [#tpu.dimension_semantics<parallel>, #tpu.dimension_semantics<arbitrary>], iteration_bounds = array<i64: 1, 2>, scalar_prefetch = 0 : i64, scratch_operands = 1 : i64, tpu.core_type = #tpu.core_type<tc>, window_params = [{transform_indices = @transform_0, window_bounds = array<i64: 2, 8, 32>}, {transform_indices = @transform_1, window_bounds = array<i64: 2, 1, 32>}, {transform_indices = @transform_2, window_bounds = array<i64: 1, 32, 96>}, {transform_indices = @transform_3, window_bounds = array<i64: 1, 1, 96>}, {transform_indices = @transform_4, window_bounds = array<i64: 1, 32, 32>}, {transform_indices = @transform_5, window_bounds = array<i64: 1, 1, 32>}, {transform_indices = @transform_6, window_bounds = array<i64: 1, 32, 64>}, {transform_indices = @transform_7, window_bounds = array<i64: 1, 1, 64>}, {transform_indices = @transform_8, window_bounds = array<i64: 1, 64, 32>}, {transform_indices = @transform_9, window_bounds = array<i64: 1, 1, 32>}, {transform_indices = @transform_10, window_bounds = array<i64: 1, 1, 32>}, {transform_indices = @transform_11, window_bounds = array<i64: 1, 1, 32>}, {transform_indices = @transform_12, window_bounds = array<i64: 1, 1, 32>}, {transform_indices = @transform_13, window_bounds = array<i64: 1, 1, 32>}, {transform_indices = @transform_14, window_bounds = array<i64: 1, 1, 32>}, {transform_indices = @transform_15, window_bounds = array<i64: 1, 1, 32>}, {transform_indices = @transform_16, window_bounds = array<i64: 2, 8, 32>}]} {
    %c0_i32 = arith.constant 0 : i32
    %0 = arith.cmpi eq, %arg1, %c0_i32 : i32
    %1 = arith.extui %0 : i1 to i32
    %c0_i32_0 = arith.constant 0 : i32
    %2 = arith.cmpi ne, %1, %c0_i32_0 : i32
    scf.if %2 {
      %c0_100 = arith.constant 0 : index
      %c0_101 = arith.constant 0 : index
      %c0_102 = arith.constant 0 : index
      %244 = vector.load %arg2[%c0_100, %c0_101, %c0_102] : memref<2x8x32xf32, #tpu.memory_space<vmem>>, vector<2x8x32xf32>
      %c0_103 = arith.constant 0 : index
      %c0_104 = arith.constant 0 : index
      %c0_105 = arith.constant 0 : index
      %245 = vector.load %arg3[%c0_103, %c0_104, %c0_105] : memref<2x1x32xf32, #tpu.memory_space<vmem>>, vector<2x1x32xf32>
      %246 = vector.broadcast %245 : vector<2x1x32xf32> to vector<2x8x32xf32>
      %247 = arith.addf %244, %246 : vector<2x8x32xf32>
      %c0_106 = arith.constant 0 : index
      %c0_107 = arith.constant 0 : index
      %c0_108 = arith.constant 0 : index
      %248 = vector.load %arg19[%c0_106, %c0_107, %c0_108] : memref<2x8x32xf32, #tpu.memory_space<vmem>>, vector<2x8x32xf32>
      tpu.vector_store %arg19[%c0_106, %c0_107, %c0_108], %247 {strides = array<i32>} : memref<2x8x32xf32, #tpu.memory_space<vmem>>, vector<2x8x32xf32>,
    } else {
    }
    %c0 = arith.constant 0 : index
    %c0_1 = arith.constant 0 : index
    %c0_2 = arith.constant 0 : index
    %3 = vector.load %arg19[%c0, %c0_1, %c0_2] : memref<2x8x32xf32, #tpu.memory_space<vmem>>, vector<2x8x32xf32>
    %4 = vector.shape_cast %3 : vector<2x8x32xf32> to vector<16x32xf32>
    %5 = tpu.iota {dimensions = array<i32: 0>} : vector<8x8xi32>
    %6 = tpu.iota {dimensions = array<i32: 1>} : vector<8x8xi32>
    %7 = arith.cmpi sle, %6, %5 : vector<8x8xi32>
    %cst = arith.constant 0.000000e+00 : f32
    %cst_3 = arith.constant 0xFF800000 : f32
    %8 = vector.broadcast %cst : f32 to vector<8x8xf32>
    %9 = vector.broadcast %cst_3 : f32 to vector<8x8xf32>
    %10 = arith.select %7, %8, %9 : vector<8x8xi1>, vector<8x8xf32>
    %11 = arith.truncf %4 : vector<16x32xf32> to vector<16x32xbf16>
    %c0_4 = arith.constant 0 : index
    %c0_5 = arith.constant 0 : index
    %c0_6 = arith.constant 0 : index
    %12 = vector.load %arg4[%c0_4, %c0_5, %c0_6] : memref<1x32x96xbf16, #tpu.memory_space<vmem>>, vector<1x32x96xbf16>
    %13 = vector.shape_cast %12 : vector<1x32x96xbf16> to vector<32x96xbf16>
    %cst_7 = arith.constant dense<0.000000e+00> : vector<16x96xf32>
    %14 = tpu.matmul %11, %13, %cst_7 {dimension_numbers = #tpu.dot_dimension_numbers<[1], [0], [0], [1], [0, 0, 1, 1], [], []>} : vector<16x32xbf16>, vector<32x96xbf16>, vector<16x96xf32> -> vector<16x96xf32>
    %c0_8 = arith.constant 0 : index
    %c0_9 = arith.constant 0 : index
    %c0_10 = arith.constant 0 : index
    %15 = vector.load %arg5[%c0_8, %c0_9, %c0_10] : memref<1x1x96xf32, #tpu.memory_space<vmem>>, vector<1x1x96xf32>
    %16 = vector.shape_cast %15 : vector<1x1x96xf32> to vector<1x96xf32>
    %17 = vector.broadcast %16 : vector<1x96xf32> to vector<16x96xf32>
    %18 = arith.addf %14, %17 : vector<16x96xf32>
    %19 = vector.extract_strided_slice %18 {offsets = [0, 0], sizes = [16, 32], strides = [1, 1]} : vector<16x96xf32> to vector<16x32xf32>
    %20 = vector.shape_cast %19 : vector<16x32xf32> to vector<2x8x32xf32>
    %21 = arith.truncf %20 : vector<2x8x32xf32> to vector<2x8x32xbf16>
    %22 = vector.extract_strided_slice %18 {offsets = [0, 32], sizes = [16, 32], strides = [1, 1]} : vector<16x96xf32> to vector<16x32xf32>
    %23 = vector.shape_cast %22 : vector<16x32xf32> to vector<2x8x32xf32>
    %24 = arith.truncf %23 : vector<2x8x32xf32> to vector<2x8x32xbf16>
    %25 = vector.extract_strided_slice %18 {offsets = [0, 64], sizes = [16, 32], strides = [1, 1]} : vector<16x96xf32> to vector<16x32xf32>
    %26 = vector.shape_cast %25 : vector<16x32xf32> to vector<2x8x32xf32>
    %27 = arith.truncf %26 : vector<2x8x32xf32> to vector<2x8x32xbf16>
    %cst_11 = arith.constant 0.000000e+00 : f32
    %28 = vector.broadcast %cst_11 : f32 to vector<16x32xf32>
    %29 = vector.extract_strided_slice %21 {offsets = [0, 0, 0], sizes = [2, 8, 8], strides = [1, 1, 1]} : vector<2x8x32xbf16> to vector<2x8x8xbf16>
    %30 = vector.extract_strided_slice %24 {offsets = [0, 0, 0], sizes = [2, 8, 8], strides = [1, 1, 1]} : vector<2x8x32xbf16> to vector<2x8x8xbf16>
    %31 = vector.extract_strided_slice %27 {offsets = [0, 0, 0], sizes = [2, 8, 8], strides = [1, 1, 1]} : vector<2x8x32xbf16> to vector<2x8x8xbf16>
    "tpu.trace_start"() <{level = 10 : i32, message = "bqd,bkd->bqk"}> : () -> ()
    %cst_12 = arith.constant dense<0.000000e+00> : vector<2x8x8xf32>
    %32 = tpu.matmul %29, %30, %cst_12 {dimension_numbers = #tpu.dot_dimension_numbers<[2], [2], [1], [1], [0, 0, 0, 1, 1, 1], [0], [0]>} : vector<2x8x8xbf16>, vector<2x8x8xbf16>, vector<2x8x8xf32> -> vector<2x8x8xf32>
    "tpu.trace_stop"() : () -> ()
    %cst_13 = arith.constant 0.353553385 : f32
    %33 = vector.broadcast %cst_13 : f32 to vector<2x8x8xf32>
    %34 = arith.mulf %32, %33 : vector<2x8x8xf32>
    %35 = vector.shape_cast %10 : vector<8x8xf32> to vector<1x8x8xf32>
    %36 = vector.broadcast %35 : vector<1x8x8xf32> to vector<2x8x8xf32>
    %37 = arith.addf %34, %36 : vector<2x8x8xf32>
    %cst_14 = arith.constant dense<0xFF800000> : vector<2x8xf32>
    %38 = vector.multi_reduction <maximumf>, %37, %cst_14 [2] : vector<2x8x8xf32> to vector<2x8xf32>
    %39 = vector.shape_cast %38 : vector<2x8xf32> to vector<2x8x1xf32>
    %40 = vector.broadcast %39 : vector<2x8x1xf32> to vector<2x8x8xf32>
    %41 = arith.subf %37, %40 : vector<2x8x8xf32>
    %42 = math.exp %41 : vector<2x8x8xf32>
    %cst_15 = arith.constant dense<0.000000e+00> : vector<2x8xf32>
    %43 = vector.multi_reduction <add>, %42, %cst_15 [2] : vector<2x8x8xf32> to vector<2x8xf32>
    %44 = vector.shape_cast %43 : vector<2x8xf32> to vector<2x8x1xf32>
    %45 = tpu.reciprocal %44 {approx = true} : vector<2x8x1xf32> -> vector<2x8x1xf32>
    %46 = vector.broadcast %45 : vector<2x8x1xf32> to vector<2x8x8xf32>
    %47 = arith.mulf %42, %46 : vector<2x8x8xf32>
    %48 = arith.truncf %47 : vector<2x8x8xf32> to vector<2x8x8xbf16>
    "tpu.trace_start"() <{level = 10 : i32, message = "bqk,bkd->bqd"}> : () -> ()
    %cst_16 = arith.constant dense<0.000000e+00> : vector<2x8x8xf32>
    %49 = tpu.matmul %48, %31, %cst_16 {dimension_numbers = #tpu.dot_dimension_numbers<[2], [1], [1], [2], [0, 0, 0, 1, 1, 2], [0], [0]>} : vector<2x8x8xbf16>, vector<2x8x8xbf16>, vector<2x8x8xf32> -> vector<2x8x8xf32>
    "tpu.trace_stop"() : () -> ()
    %50 = vector.shape_cast %49 : vector<2x8x8xf32> to vector<16x8xf32>
    %51 = arith.truncf %50 : vector<16x8xf32> to vector<16x8xbf16>
    %c0_17 = arith.constant 0 : index
    %c0_18 = arith.constant 0 : index
    %c0_19 = arith.constant 0 : index
    %52 = vector.load %arg6[%c0_17, %c0_18, %c0_19] : memref<1x32x32xbf16, #tpu.memory_space<vmem>>, vector<1x8x32xbf16>
    %53 = vector.shape_cast %52 : vector<1x8x32xbf16> to vector<8x32xbf16>
    %cst_20 = arith.constant dense<0.000000e+00> : vector<16x32xf32>
    %54 = tpu.matmul %51, %53, %cst_20 {dimension_numbers = #tpu.dot_dimension_numbers<[1], [0], [0], [1], [0, 0, 1, 1], [], []>} : vector<16x8xbf16>, vector<8x32xbf16>, vector<16x32xf32> -> vector<16x32xf32>
    %55 = arith.addf %28, %54 : vector<16x32xf32>
    %56 = vector.extract_strided_slice %21 {offsets = [0, 0, 8], sizes = [2, 8, 8], strides = [1, 1, 1]} : vector<2x8x32xbf16> to vector<2x8x8xbf16>
    %57 = vector.extract_strided_slice %24 {offsets = [0, 0, 8], sizes = [2, 8, 8], strides = [1, 1, 1]} : vector<2x8x32xbf16> to vector<2x8x8xbf16>
    %58 = vector.extract_strided_slice %27 {offsets = [0, 0, 8], sizes = [2, 8, 8], strides = [1, 1, 1]} : vector<2x8x32xbf16> to vector<2x8x8xbf16>
    "tpu.trace_start"() <{level = 10 : i32, message = "bqd,bkd->bqk"}> : () -> ()
    %cst_21 = arith.constant dense<0.000000e+00> : vector<2x8x8xf32>
    %59 = tpu.matmul %56, %57, %cst_21 {dimension_numbers = #tpu.dot_dimension_numbers<[2], [2], [1], [1], [0, 0, 0, 1, 1, 1], [0], [0]>} : vector<2x8x8xbf16>, vector<2x8x8xbf16>, vector<2x8x8xf32> -> vector<2x8x8xf32>
    "tpu.trace_stop"() : () -> ()
    %cst_22 = arith.constant 0.353553385 : f32
    %60 = vector.broadcast %cst_22 : f32 to vector<2x8x8xf32>
    %61 = arith.mulf %59, %60 : vector<2x8x8xf32>
    %62 = vector.shape_cast %10 : vector<8x8xf32> to vector<1x8x8xf32>
    %63 = vector.broadcast %62 : vector<1x8x8xf32> to vector<2x8x8xf32>
    %64 = arith.addf %61, %63 : vector<2x8x8xf32>
    %cst_23 = arith.constant dense<0xFF800000> : vector<2x8xf32>
    %65 = vector.multi_reduction <maximumf>, %64, %cst_23 [2] : vector<2x8x8xf32> to vector<2x8xf32>
    %66 = vector.shape_cast %65 : vector<2x8xf32> to vector<2x8x1xf32>
    %67 = vector.broadcast %66 : vector<2x8x1xf32> to vector<2x8x8xf32>
    %68 = arith.subf %64, %67 : vector<2x8x8xf32>
    %69 = math.exp %68 : vector<2x8x8xf32>
    %cst_24 = arith.constant dense<0.000000e+00> : vector<2x8xf32>
    %70 = vector.multi_reduction <add>, %69, %cst_24 [2] : vector<2x8x8xf32> to vector<2x8xf32>
    %71 = vector.shape_cast %70 : vector<2x8xf32> to vector<2x8x1xf32>
    %72 = tpu.reciprocal %71 {approx = true} : vector<2x8x1xf32> -> vector<2x8x1xf32>
    %73 = vector.broadcast %72 : vector<2x8x1xf32> to vector<2x8x8xf32>
    %74 = arith.mulf %69, %73 : vector<2x8x8xf32>
    %75 = arith.truncf %74 : vector<2x8x8xf32> to vector<2x8x8xbf16>
    "tpu.trace_start"() <{level = 10 : i32, message = "bqk,bkd->bqd"}> : () -> ()
    %cst_25 = arith.constant dense<0.000000e+00> : vector<2x8x8xf32>
    %76 = tpu.matmul %75, %58, %cst_25 {dimension_numbers = #tpu.dot_dimension_numbers<[2], [1], [1], [2], [0, 0, 0, 1, 1, 2], [0], [0]>} : vector<2x8x8xbf16>, vector<2x8x8xbf16>, vector<2x8x8xf32> -> vector<2x8x8xf32>
    "tpu.trace_stop"() : () -> ()
    %77 = vector.shape_cast %76 : vector<2x8x8xf32> to vector<16x8xf32>
    %78 = arith.truncf %77 : vector<16x8xf32> to vector<16x8xbf16>
    %c0_26 = arith.constant 0 : index
    %c8 = arith.constant 8 : index
    %c0_27 = arith.constant 0 : index
    %79 = vector.load %arg6[%c0_26, %c8, %c0_27] : memref<1x32x32xbf16, #tpu.memory_space<vmem>>, vector<1x8x32xbf16>
    %80 = vector.shape_cast %79 : vector<1x8x32xbf16> to vector<8x32xbf16>
    %cst_28 = arith.constant dense<0.000000e+00> : vector<16x32xf32>
    %81 = tpu.matmul %78, %80, %cst_28 {dimension_numbers = #tpu.dot_dimension_numbers<[1], [0], [0], [1], [0, 0, 1, 1], [], []>} : vector<16x8xbf16>, vector<8x32xbf16>, vector<16x32xf32> -> vector<16x32xf32>
    %82 = arith.addf %55, %81 : vector<16x32xf32>
    %83 = vector.extract_strided_slice %21 {offsets = [0, 0, 16], sizes = [2, 8, 8], strides = [1, 1, 1]} : vector<2x8x32xbf16> to vector<2x8x8xbf16>
    %84 = vector.extract_strided_slice %24 {offsets = [0, 0, 16], sizes = [2, 8, 8], strides = [1, 1, 1]} : vector<2x8x32xbf16> to vector<2x8x8xbf16>
    %85 = vector.extract_strided_slice %27 {offsets = [0, 0, 16], sizes = [2, 8, 8], strides = [1, 1, 1]} : vector<2x8x32xbf16> to vector<2x8x8xbf16>
    "tpu.trace_start"() <{level = 10 : i32, message = "bqd,bkd->bqk"}> : () -> ()
    %cst_29 = arith.constant dense<0.000000e+00> : vector<2x8x8xf32>
    %86 = tpu.matmul %83, %84, %cst_29 {dimension_numbers = #tpu.dot_dimension_numbers<[2], [2], [1], [1], [0, 0, 0, 1, 1, 1], [0], [0]>} : vector<2x8x8xbf16>, vector<2x8x8xbf16>, vector<2x8x8xf32> -> vector<2x8x8xf32>
    "tpu.trace_stop"() : () -> ()
    %cst_30 = arith.constant 0.353553385 : f32
    %87 = vector.broadcast %cst_30 : f32 to vector<2x8x8xf32>
    %88 = arith.mulf %86, %87 : vector<2x8x8xf32>
    %89 = vector.shape_cast %10 : vector<8x8xf32> to vector<1x8x8xf32>
    %90 = vector.broadcast %89 : vector<1x8x8xf32> to vector<2x8x8xf32>
    %91 = arith.addf %88, %90 : vector<2x8x8xf32>
    %cst_31 = arith.constant dense<0xFF800000> : vector<2x8xf32>
    %92 = vector.multi_reduction <maximumf>, %91, %cst_31 [2] : vector<2x8x8xf32> to vector<2x8xf32>
    %93 = vector.shape_cast %92 : vector<2x8xf32> to vector<2x8x1xf32>
    %94 = vector.broadcast %93 : vector<2x8x1xf32> to vector<2x8x8xf32>
    %95 = arith.subf %91, %94 : vector<2x8x8xf32>
    %96 = math.exp %95 : vector<2x8x8xf32>
    %cst_32 = arith.constant dense<0.000000e+00> : vector<2x8xf32>
    %97 = vector.multi_reduction <add>, %96, %cst_32 [2] : vector<2x8x8xf32> to vector<2x8xf32>
    %98 = vector.shape_cast %97 : vector<2x8xf32> to vector<2x8x1xf32>
    %99 = tpu.reciprocal %98 {approx = true} : vector<2x8x1xf32> -> vector<2x8x1xf32>
    %100 = vector.broadcast %99 : vector<2x8x1xf32> to vector<2x8x8xf32>
    %101 = arith.mulf %96, %100 : vector<2x8x8xf32>
    %102 = arith.truncf %101 : vector<2x8x8xf32> to vector<2x8x8xbf16>
    "tpu.trace_start"() <{level = 10 : i32, message = "bqk,bkd->bqd"}> : () -> ()
    %cst_33 = arith.constant dense<0.000000e+00> : vector<2x8x8xf32>
    %103 = tpu.matmul %102, %85, %cst_33 {dimension_numbers = #tpu.dot_dimension_numbers<[2], [1], [1], [2], [0, 0, 0, 1, 1, 2], [0], [0]>} : vector<2x8x8xbf16>, vector<2x8x8xbf16>, vector<2x8x8xf32> -> vector<2x8x8xf32>
    "tpu.trace_stop"() : () -> ()
    %104 = vector.shape_cast %103 : vector<2x8x8xf32> to vector<16x8xf32>
    %105 = arith.truncf %104 : vector<16x8xf32> to vector<16x8xbf16>
    %c0_34 = arith.constant 0 : index
    %c16 = arith.constant 16 : index
    %c0_35 = arith.constant 0 : index
    %106 = vector.load %arg6[%c0_34, %c16, %c0_35] : memref<1x32x32xbf16, #tpu.memory_space<vmem>>, vector<1x8x32xbf16>
    %107 = vector.shape_cast %106 : vector<1x8x32xbf16> to vector<8x32xbf16>
    %cst_36 = arith.constant dense<0.000000e+00> : vector<16x32xf32>
    %108 = tpu.matmul %105, %107, %cst_36 {dimension_numbers = #tpu.dot_dimension_numbers<[1], [0], [0], [1], [0, 0, 1, 1], [], []>} : vector<16x8xbf16>, vector<8x32xbf16>, vector<16x32xf32> -> vector<16x32xf32>
    %109 = arith.addf %82, %108 : vector<16x32xf32>
    %110 = vector.extract_strided_slice %21 {offsets = [0, 0, 24], sizes = [2, 8, 8], strides = [1, 1, 1]} : vector<2x8x32xbf16> to vector<2x8x8xbf16>
    %111 = vector.extract_strided_slice %24 {offsets = [0, 0, 24], sizes = [2, 8, 8], strides = [1, 1, 1]} : vector<2x8x32xbf16> to vector<2x8x8xbf16>
    %112 = vector.extract_strided_slice %27 {offsets = [0, 0, 24], sizes = [2, 8, 8], strides = [1, 1, 1]} : vector<2x8x32xbf16> to vector<2x8x8xbf16>
    "tpu.trace_start"() <{level = 10 : i32, message = "bqd,bkd->bqk"}> : () -> ()
    %cst_37 = arith.constant dense<0.000000e+00> : vector<2x8x8xf32>
    %113 = tpu.matmul %110, %111, %cst_37 {dimension_numbers = #tpu.dot_dimension_numbers<[2], [2], [1], [1], [0, 0, 0, 1, 1, 1], [0], [0]>} : vector<2x8x8xbf16>, vector<2x8x8xbf16>, vector<2x8x8xf32> -> vector<2x8x8xf32>
    "tpu.trace_stop"() : () -> ()
    %cst_38 = arith.constant 0.353553385 : f32
    %114 = vector.broadcast %cst_38 : f32 to vector<2x8x8xf32>
    %115 = arith.mulf %113, %114 : vector<2x8x8xf32>
    %116 = vector.shape_cast %10 : vector<8x8xf32> to vector<1x8x8xf32>
    %117 = vector.broadcast %116 : vector<1x8x8xf32> to vector<2x8x8xf32>
    %118 = arith.addf %115, %117 : vector<2x8x8xf32>
    %cst_39 = arith.constant dense<0xFF800000> : vector<2x8xf32>
    %119 = vector.multi_reduction <maximumf>, %118, %cst_39 [2] : vector<2x8x8xf32> to vector<2x8xf32>
    %120 = vector.shape_cast %119 : vector<2x8xf32> to vector<2x8x1xf32>
    %121 = vector.broadcast %120 : vector<2x8x1xf32> to vector<2x8x8xf32>
    %122 = arith.subf %118, %121 : vector<2x8x8xf32>
    %123 = math.exp %122 : vector<2x8x8xf32>
    %cst_40 = arith.constant dense<0.000000e+00> : vector<2x8xf32>
    %124 = vector.multi_reduction <add>, %123, %cst_40 [2] : vector<2x8x8xf32> to vector<2x8xf32>
    %125 = vector.shape_cast %124 : vector<2x8xf32> to vector<2x8x1xf32>
    %126 = tpu.reciprocal %125 {approx = true} : vector<2x8x1xf32> -> vector<2x8x1xf32>
    %127 = vector.broadcast %126 : vector<2x8x1xf32> to vector<2x8x8xf32>
    %128 = arith.mulf %123, %127 : vector<2x8x8xf32>
    %129 = arith.truncf %128 : vector<2x8x8xf32> to vector<2x8x8xbf16>
    "tpu.trace_start"() <{level = 10 : i32, message = "bqk,bkd->bqd"}> : () -> ()
    %cst_41 = arith.constant dense<0.000000e+00> : vector<2x8x8xf32>
    %130 = tpu.matmul %129, %112, %cst_41 {dimension_numbers = #tpu.dot_dimension_numbers<[2], [1], [1], [2], [0, 0, 0, 1, 1, 2], [0], [0]>} : vector<2x8x8xbf16>, vector<2x8x8xbf16>, vector<2x8x8xf32> -> vector<2x8x8xf32>
    "tpu.trace_stop"() : () -> ()
    %131 = vector.shape_cast %130 : vector<2x8x8xf32> to vector<16x8xf32>
    %132 = arith.truncf %131 : vector<16x8xf32> to vector<16x8xbf16>
    %c0_42 = arith.constant 0 : index
    %c24 = arith.constant 24 : index
    %c0_43 = arith.constant 0 : index
    %133 = vector.load %arg6[%c0_42, %c24, %c0_43] : memref<1x32x32xbf16, #tpu.memory_space<vmem>>, vector<1x8x32xbf16>
    %134 = vector.shape_cast %133 : vector<1x8x32xbf16> to vector<8x32xbf16>
    %cst_44 = arith.constant dense<0.000000e+00> : vector<16x32xf32>
    %135 = tpu.matmul %132, %134, %cst_44 {dimension_numbers = #tpu.dot_dimension_numbers<[1], [0], [0], [1], [0, 0, 1, 1], [], []>} : vector<16x8xbf16>, vector<8x32xbf16>, vector<16x32xf32> -> vector<16x32xf32>
    %136 = arith.addf %109, %135 : vector<16x32xf32>
    %c0_45 = arith.constant 0 : index
    %c0_46 = arith.constant 0 : index
    %c0_47 = arith.constant 0 : index
    %137 = vector.load %arg7[%c0_45, %c0_46, %c0_47] : memref<1x1x32xf32, #tpu.memory_space<vmem>>, vector<1x1x32xf32>
    %138 = vector.shape_cast %137 : vector<1x1x32xf32> to vector<1x32xf32>
    %139 = vector.broadcast %138 : vector<1x32xf32> to vector<16x32xf32>
    %140 = arith.addf %136, %139 : vector<16x32xf32>
    %141 = arith.addf %4, %140 : vector<16x32xf32>
    %c0_48 = arith.constant 0 : index
    %c0_49 = arith.constant 0 : index
    %c0_50 = arith.constant 0 : index
    %142 = vector.load %arg12[%c0_48, %c0_49, %c0_50] : memref<1x1x32xf32, #tpu.memory_space<vmem>>, vector<1x1x32xf32>
    %143 = vector.shape_cast %142 : vector<1x1x32xf32> to vector<1x32xf32>
    %c0_51 = arith.constant 0 : index
    %c0_52 = arith.constant 0 : index
    %c0_53 = arith.constant 0 : index
    %144 = vector.load %arg13[%c0_51, %c0_52, %c0_53] : memref<1x1x32xf32, #tpu.memory_space<vmem>>, vector<1x1x32xf32>
    %145 = vector.shape_cast %144 : vector<1x1x32xf32> to vector<1x32xf32>
    %cst_54 = arith.constant dense<0.000000e+00> : vector<16xf32>
    %146 = vector.multi_reduction <add>, %141, %cst_54 [1] : vector<16x32xf32> to vector<16xf32>
    %147 = vector.shape_cast %146 : vector<16xf32> to vector<16x1xf32>
    %cst_55 = arith.constant 3.200000e+01 : f32
    %148 = vector.broadcast %cst_55 : f32 to vector<16x1xf32>
    %149 = arith.divf %147, %148 : vector<16x1xf32>
    %150 = vector.broadcast %149 : vector<16x1xf32> to vector<16x32xf32>
    %151 = arith.subf %141, %150 : vector<16x32xf32>
    %152 = arith.mulf %151, %151 : vector<16x32xf32>
    %cst_56 = arith.constant dense<0.000000e+00> : vector<16xf32>
    %153 = vector.multi_reduction <add>, %152, %cst_56 [1] : vector<16x32xf32> to vector<16xf32>
    %154 = vector.shape_cast %153 : vector<16xf32> to vector<16x1xf32>
    %cst_57 = arith.constant 3.200000e+01 : f32
    %155 = vector.broadcast %cst_57 : f32 to vector<16x1xf32>
    %156 = arith.divf %154, %155 : vector<16x1xf32>
    %157 = vector.broadcast %149 : vector<16x1xf32> to vector<16x32xf32>
    %158 = arith.subf %141, %157 : vector<16x32xf32>
    %cst_58 = arith.constant 9.99999974E-6 : f32
    %159 = vector.broadcast %cst_58 : f32 to vector<16x1xf32>
    %160 = arith.addf %156, %159 : vector<16x1xf32>
    %161 = math.rsqrt %160 : vector<16x1xf32>
    %162 = vector.broadcast %161 : vector<16x1xf32> to vector<16x32xf32>
    %163 = arith.mulf %158, %162 : vector<16x32xf32>
    %164 = vector.broadcast %143 : vector<1x32xf32> to vector<16x32xf32>
    %165 = arith.mulf %163, %164 : vector<16x32xf32>
    %166 = vector.broadcast %145 : vector<1x32xf32> to vector<16x32xf32>
    %167 = arith.addf %165, %166 : vector<16x32xf32>
    %c0_59 = arith.constant 0 : index
    %c0_60 = arith.constant 0 : index
    %c0_61 = arith.constant 0 : index
    %168 = vector.load %arg14[%c0_59, %c0_60, %c0_61] : memref<1x1x32xf32, #tpu.memory_space<vmem>>, vector<1x1x32xf32>
    %169 = vector.shape_cast %168 : vector<1x1x32xf32> to vector<1x32xf32>
    %c0_62 = arith.constant 0 : index
    %c0_63 = arith.constant 0 : index
    %c0_64 = arith.constant 0 : index
    %170 = vector.load %arg15[%c0_62, %c0_63, %c0_64] : memref<1x1x32xf32, #tpu.memory_space<vmem>>, vector<1x1x32xf32>
    %171 = vector.shape_cast %170 : vector<1x1x32xf32> to vector<1x32xf32>
    %cst_65 = arith.constant dense<0.000000e+00> : vector<16xf32>
    %172 = vector.multi_reduction <add>, %167, %cst_65 [1] : vector<16x32xf32> to vector<16xf32>
    %173 = vector.shape_cast %172 : vector<16xf32> to vector<16x1xf32>
    %cst_66 = arith.constant 3.200000e+01 : f32
    %174 = vector.broadcast %cst_66 : f32 to vector<16x1xf32>
    %175 = arith.divf %173, %174 : vector<16x1xf32>
    %176 = vector.broadcast %175 : vector<16x1xf32> to vector<16x32xf32>
    %177 = arith.subf %167, %176 : vector<16x32xf32>
    %178 = arith.mulf %177, %177 : vector<16x32xf32>
    %cst_67 = arith.constant dense<0.000000e+00> : vector<16xf32>
    %179 = vector.multi_reduction <add>, %178, %cst_67 [1] : vector<16x32xf32> to vector<16xf32>
    %180 = vector.shape_cast %179 : vector<16xf32> to vector<16x1xf32>
    %cst_68 = arith.constant 3.200000e+01 : f32
    %181 = vector.broadcast %cst_68 : f32 to vector<16x1xf32>
    %182 = arith.divf %180, %181 : vector<16x1xf32>
    %183 = vector.broadcast %175 : vector<16x1xf32> to vector<16x32xf32>
    %184 = arith.subf %167, %183 : vector<16x32xf32>
    %cst_69 = arith.constant 9.99999974E-6 : f32
    %185 = vector.broadcast %cst_69 : f32 to vector<16x1xf32>
    %186 = arith.addf %182, %185 : vector<16x1xf32>
    %187 = math.rsqrt %186 : vector<16x1xf32>
    %188 = vector.broadcast %187 : vector<16x1xf32> to vector<16x32xf32>
    %189 = arith.mulf %184, %188 : vector<16x32xf32>
    %190 = vector.broadcast %169 : vector<1x32xf32> to vector<16x32xf32>
    %191 = arith.mulf %189, %190 : vector<16x32xf32>
    %192 = vector.broadcast %171 : vector<1x32xf32> to vector<16x32xf32>
    %193 = arith.addf %191, %192 : vector<16x32xf32>
    %194 = arith.truncf %193 : vector<16x32xf32> to vector<16x32xbf16>
    %c0_70 = arith.constant 0 : index
    %c0_71 = arith.constant 0 : index
    %c0_72 = arith.constant 0 : index
    %195 = vector.load %arg8[%c0_70, %c0_71, %c0_72] : memref<1x32x64xbf16, #tpu.memory_space<vmem>>, vector<1x32x64xbf16>
    %196 = vector.shape_cast %195 : vector<1x32x64xbf16> to vector<32x64xbf16>
    %cst_73 = arith.constant dense<0.000000e+00> : vector<16x64xf32>
    %197 = tpu.matmul %194, %196, %cst_73 {dimension_numbers = #tpu.dot_dimension_numbers<[1], [0], [0], [1], [0, 0, 1, 1], [], []>} : vector<16x32xbf16>, vector<32x64xbf16>, vector<16x64xf32> -> vector<16x64xf32>
    %c0_74 = arith.constant 0 : index
    %c0_75 = arith.constant 0 : index
    %c0_76 = arith.constant 0 : index
    %198 = vector.load %arg9[%c0_74, %c0_75, %c0_76] : memref<1x1x64xf32, #tpu.memory_space<vmem>>, vector<1x1x64xf32>
    %199 = vector.shape_cast %198 : vector<1x1x64xf32> to vector<1x64xf32>
    %200 = vector.broadcast %199 : vector<1x64xf32> to vector<16x64xf32>
    %201 = arith.addf %197, %200 : vector<16x64xf32>
    %cst_77 = arith.constant 0.000000e+00 : f32
    %202 = vector.broadcast %cst_77 : f32 to vector<16x64xf32>
    %203 = arith.maximumf %201, %202 : vector<16x64xf32>
    %204 = arith.truncf %203 : vector<16x64xf32> to vector<16x64xbf16>
    %c0_78 = arith.constant 0 : index
    %c0_79 = arith.constant 0 : index
    %c0_80 = arith.constant 0 : index
    %205 = vector.load %arg10[%c0_78, %c0_79, %c0_80] : memref<1x64x32xbf16, #tpu.memory_space<vmem>>, vector<1x64x32xbf16>
    %206 = vector.shape_cast %205 : vector<1x64x32xbf16> to vector<64x32xbf16>
    %cst_81 = arith.constant dense<0.000000e+00> : vector<16x32xf32>
    %207 = tpu.matmul %204, %206, %cst_81 {dimension_numbers = #tpu.dot_dimension_numbers<[1], [0], [0], [1], [0, 0, 1, 1], [], []>} : vector<16x64xbf16>, vector<64x32xbf16>, vector<16x32xf32> -> vector<16x32xf32>
    %c0_82 = arith.constant 0 : index
    %c0_83 = arith.constant 0 : index
    %c0_84 = arith.constant 0 : index
    %208 = vector.load %arg11[%c0_82, %c0_83, %c0_84] : memref<1x1x32xf32, #tpu.memory_space<vmem>>, vector<1x1x32xf32>
    %209 = vector.shape_cast %208 : vector<1x1x32xf32> to vector<1x32xf32>
    %210 = vector.broadcast %209 : vector<1x32xf32> to vector<16x32xf32>
    %211 = arith.addf %207, %210 : vector<16x32xf32>
    %212 = arith.addf %193, %211 : vector<16x32xf32>
    %c0_85 = arith.constant 0 : index
    %c0_86 = arith.constant 0 : index
    %c0_87 = arith.constant 0 : index
    %213 = vector.load %arg16[%c0_85, %c0_86, %c0_87] : memref<1x1x32xf32, #tpu.memory_space<vmem>>, vector<1x1x32xf32>
    %214 = vector.shape_cast %213 : vector<1x1x32xf32> to vector<1x32xf32>
    %c0_88 = arith.constant 0 : index
    %c0_89 = arith.constant 0 : index
    %c0_90 = arith.constant 0 : index
    %215 = vector.load %arg17[%c0_88, %c0_89, %c0_90] : memref<1x1x32xf32, #tpu.memory_space<vmem>>, vector<1x1x32xf32>
    %216 = vector.shape_cast %215 : vector<1x1x32xf32> to vector<1x32xf32>
    %cst_91 = arith.constant dense<0.000000e+00> : vector<16xf32>
    %217 = vector.multi_reduction <add>, %212, %cst_91 [1] : vector<16x32xf32> to vector<16xf32>
    %218 = vector.shape_cast %217 : vector<16xf32> to vector<16x1xf32>
    %cst_92 = arith.constant 3.200000e+01 : f32
    %219 = vector.broadcast %cst_92 : f32 to vector<16x1xf32>
    %220 = arith.divf %218, %219 : vector<16x1xf32>
    %221 = vector.broadcast %220 : vector<16x1xf32> to vector<16x32xf32>
    %222 = arith.subf %212, %221 : vector<16x32xf32>
    %223 = arith.mulf %222, %222 : vector<16x32xf32>
    %cst_93 = arith.constant dense<0.000000e+00> : vector<16xf32>
    %224 = vector.multi_reduction <add>, %223, %cst_93 [1] : vector<16x32xf32> to vector<16xf32>
    %225 = vector.shape_cast %224 : vector<16xf32> to vector<16x1xf32>
    %cst_94 = arith.constant 3.200000e+01 : f32
    %226 = vector.broadcast %cst_94 : f32 to vector<16x1xf32>
    %227 = arith.divf %225, %226 : vector<16x1xf32>
    %228 = vector.broadcast %220 : vector<16x1xf32> to vector<16x32xf32>
    %229 = arith.subf %212, %228 : vector<16x32xf32>
    %cst_95 = arith.constant 9.99999974E-6 : f32
    %230 = vector.broadcast %cst_95 : f32 to vector<16x1xf32>
    %231 = arith.addf %227, %230 : vector<16x1xf32>
    %232 = math.rsqrt %231 : vector<16x1xf32>
    %233 = vector.broadcast %232 : vector<16x1xf32> to vector<16x32xf32>
    %234 = arith.mulf %229, %233 : vector<16x32xf32>
    %235 = vector.broadcast %214 : vector<1x32xf32> to vector<16x32xf32>
    %236 = arith.mulf %234, %235 : vector<16x32xf32>
    %237 = vector.broadcast %216 : vector<1x32xf32> to vector<16x32xf32>
    %238 = arith.addf %236, %237 : vector<16x32xf32>
    %239 = vector.shape_cast %238 : vector<16x32xf32> to vector<2x8x32xf32>
    %c0_96 = arith.constant 0 : index
    %c0_97 = arith.constant 0 : index
    %c0_98 = arith.constant 0 : index
    %240 = vector.load %arg19[%c0_96, %c0_97, %c0_98] : memref<2x8x32xf32, #tpu.memory_space<vmem>>, vector<2x8x32xf32>
    tpu.vector_store %arg19[%c0_96, %c0_97, %c0_98], %239 {strides = array<i32>} : memref<2x8x32xf32, #tpu.memory_space<vmem>>, vector<2x8x32xf32>,
    %c1_i32 = arith.constant 1 : i32
    %241 = arith.cmpi eq, %arg1, %c1_i32 : i32
    %242 = arith.extui %241 : i1 to i32
    %c0_i32_99 = arith.constant 0 : i32
    %243 = arith.cmpi ne, %242, %c0_i32_99 : i32
    scf.if %243 {
      %c0_100 = arith.constant 0 : index
      %c0_101 = arith.constant 0 : index
      %c0_102 = arith.constant 0 : index
      %244 = vector.load %arg19[%c0_100, %c0_101, %c0_102] : memref<2x8x32xf32, #tpu.memory_space<vmem>>, vector<2x8x32xf32>
      %c0_103 = arith.constant 0 : index
      %c0_104 = arith.constant 0 : index
      %c0_105 = arith.constant 0 : index
      %245 = vector.load %arg18[%c0_103, %c0_104, %c0_105] : memref<2x8x32xf32, #tpu.memory_space<vmem>>, vector<2x8x32xf32>
      tpu.vector_store %arg18[%c0_103, %c0_104, %c0_105], %244 {strides = array<i32>} : memref<2x8x32xf32, #tpu.memory_space<vmem>>, vector<2x8x32xf32>,
    } else {
    }
    return
  }
  func.func @transform_0(%arg0: i32, %arg1: i32) -> (i32, i32, i32) {
    %c0_i32 = arith.constant 0 : i32
    %c0_i32_0 = arith.constant 0 : i32
    %c0_i32_1 = arith.constant 0 : i32
    return %arg0, %c0_i32, %c0_i32_0 : i32, i32, i32
  }
  func.func @transform_1(%arg0: i32, %arg1: i32) -> (i32, i32, i32) {
    %c0_i32 = arith.constant 0 : i32
    %c0_i32_0 = arith.constant 0 : i32
    %c0_i32_1 = arith.constant 0 : i32
    return %arg0, %c0_i32, %c0_i32_0 : i32, i32, i32
  }
  func.func @transform_2(%arg0: i32, %arg1: i32) -> (i32, i32, i32) {
    %c0_i32 = arith.constant 0 : i32
    %c0_i32_0 = arith.constant 0 : i32
    %c0_i32_1 = arith.constant 0 : i32
    return %arg1, %c0_i32, %c0_i32_0 : i32, i32, i32
  }
  func.func @transform_3(%arg0: i32, %arg1: i32) -> (i32, i32, i32) {
    %c0_i32 = arith.constant 0 : i32
    %c0_i32_0 = arith.constant 0 : i32
    %c0_i32_1 = arith.constant 0 : i32
    return %arg1, %c0_i32, %c0_i32_0 : i32, i32, i32
  }
  func.func @transform_4(%arg0: i32, %arg1: i32) -> (i32, i32, i32) {
    %c0_i32 = arith.constant 0 : i32
    %c0_i32_0 = arith.constant 0 : i32
    %c0_i32_1 = arith.constant 0 : i32
    return %arg1, %c0_i32, %c0_i32_0 : i32, i32, i32
  }
  func.func @transform_5(%arg0: i32, %arg1: i32) -> (i32, i32, i32) {
    %c0_i32 = arith.constant 0 : i32
    %c0_i32_0 = arith.constant 0 : i32
    %c0_i32_1 = arith.constant 0 : i32
    return %arg1, %c0_i32, %c0_i32_0 : i32, i32, i32
  }
  func.func @transform_6(%arg0: i32, %arg1: i32) -> (i32, i32, i32) {
    %c0_i32 = arith.constant 0 : i32
    %c0_i32_0 = arith.constant 0 : i32
    %c0_i32_1 = arith.constant 0 : i32
    return %arg1, %c0_i32, %c0_i32_0 : i32, i32, i32
  }
  func.func @transform_7(%arg0: i32, %arg1: i32) -> (i32, i32, i32) {
    %c0_i32 = arith.constant 0 : i32
    %c0_i32_0 = arith.constant 0 : i32
    %c0_i32_1 = arith.constant 0 : i32
    return %arg1, %c0_i32, %c0_i32_0 : i32, i32, i32
  }
  func.func @transform_8(%arg0: i32, %arg1: i32) -> (i32, i32, i32) {
    %c0_i32 = arith.constant 0 : i32
    %c0_i32_0 = arith.constant 0 : i32
    %c0_i32_1 = arith.constant 0 : i32
    return %arg1, %c0_i32, %c0_i32_0 : i32, i32, i32
  }
  func.func @transform_9(%arg0: i32, %arg1: i32) -> (i32, i32, i32) {
    %c0_i32 = arith.constant 0 : i32
    %c0_i32_0 = arith.constant 0 : i32
    %c0_i32_1 = arith.constant 0 : i32
    return %arg1, %c0_i32, %c0_i32_0 : i32, i32, i32
  }
  func.func @transform_10(%arg0: i32, %arg1: i32) -> (i32, i32, i32) {
    %c0_i32 = arith.constant 0 : i32
    %c0_i32_0 = arith.constant 0 : i32
    %c0_i32_1 = arith.constant 0 : i32
    return %arg1, %c0_i32, %c0_i32_0 : i32, i32, i32
  }
  func.func @transform_11(%arg0: i32, %arg1: i32) -> (i32, i32, i32) {
    %c0_i32 = arith.constant 0 : i32
    %c0_i32_0 = arith.constant 0 : i32
    %c0_i32_1 = arith.constant 0 : i32
    return %arg1, %c0_i32, %c0_i32_0 : i32, i32, i32
  }
  func.func @transform_12(%arg0: i32, %arg1: i32) -> (i32, i32, i32) {
    %c0_i32 = arith.constant 0 : i32
    %c0_i32_0 = arith.constant 0 : i32
    %c0_i32_1 = arith.constant 0 : i32
    return %arg1, %c0_i32, %c0_i32_0 : i32, i32, i32
  }
  func.func @transform_13(%arg0: i32, %arg1: i32) -> (i32, i32, i32) {
    %c0_i32 = arith.constant 0 : i32
    %c0_i32_0 = arith.constant 0 : i32
    %c0_i32_1 = arith.constant 0 : i32
    return %arg1, %c0_i32, %c0_i32_0 : i32, i32, i32
  }
  func.func @transform_14(%arg0: i32, %arg1: i32) -> (i32, i32, i32) {
    %c0_i32 = arith.constant 0 : i32
    %c0_i32_0 = arith.constant 0 : i32
    %c0_i32_1 = arith.constant 0 : i32
    return %arg1, %c0_i32, %c0_i32_0 : i32, i32, i32
  }
  func.func @transform_15(%arg0: i32, %arg1: i32) -> (i32, i32, i32) {
    %c0_i32 = arith.constant 0 : i32
    %c0_i32_0 = arith.constant 0 : i32
    %c0_i32_1 = arith.constant 0 : i32
    return %arg1, %c0_i32, %c0_i32_0 : i32, i32, i32
  }
  func.func @transform_16(%arg0: i32, %arg1: i32) -> (i32, i32, i32) {
    %c0_i32 = arith.constant 0 : i32
    %c0_i32_0 = arith.constant 0 : i32
    %c0_i32_1 = arith.constant 0 : i32
    return %arg0, %c0_i32, %c0_i32_0 : i32, i32, i32
  }
}

</mosaic_0001>

<bundles_post_ra>
// kernel: tpu_custom_call.1
= control target key start
LH: loop header
LB: loop body
LE: loop exit
PB: predicated region body
PF: predicated region fallthrough
CT: control target
= control target key end

     0   :  { %s3071_s0 = inlined_call_operand.hbm [shape: f32[2,8,32], index: 0, kind: input, shape index: {}]   ;;  %s3072_s1 = inlined_call_operand.hbm [shape: f32[2,1,32], index: 1, kind: input, shape index: {}]   ;;  %s3073_s2 = inlined_call_operand.vmem [shape: bf16[2,32,96], index: 2, kind: input, shape index: {}]   ;;  %s3074_s3 = inlined_call_operand.hbm [shape: f32[2,1,96], index: 3, kind: input, shape index: {}]   ;;  %s3075_s4 = inlined_call_operand.vmem [shape: bf16[2,32,32], index: 4, kind: input, shape index: {}]   ;;  %s3076_s5 = inlined_call_operand.vmem [shape: f32[2,1,32], index: 5, kind: input, shape index: {}]   ;;  %s3077_s6 = inlined_call_operand.vmem [shape: bf16[2,32,64], index: 6, kind: input, shape index: {}]   ;;  %s3078_s7 = inlined_call_operand.vmem [shape: f32[2,1,64], index: 7, kind: input, shape index: {}]   ;;  %s3079_s8 = inlined_call_operand.vmem [shape: bf16[2,64,32], index: 8, kind: input, shape index: {}]   ;;  %s3080_s9 = inlined_call_operand.vmem [shape: f32[2,1,32], index: 9, kind: input, shape index: {}]   ;;  %s3081_s10 = inlined_call_operand.vmem [shape: f32[2,1,32], index: 10, kind: input, shape index: {}]   ;;  %s3082_s11 = inlined_call_operand.hbm [shape: f32[2,1,32], index: 11, kind: input, shape index: {}]   ;;  %s3083_s12 = inlined_call_operand.vmem [shape: f32[2,1,32], index: 12, kind: input, shape index: {}]   ;;  %s3084_s13 = inlined_call_operand.hbm [shape: f32[2,1,32], index: 13, kind: input, shape index: {}]   ;;  %s3085_s14 = inlined_call_operand.vmem [shape: f32[2,1,32], index: 14, kind: input, shape index: {}]   ;;  %s3086_s15 = inlined_call_operand.hbm [shape: f32[2,1,32], index: 15, kind: input, shape index: {}]   ;;  %s3087_s16 = inlined_call_operand.hbm [shape: f32[2,8,32], index: 16, kind: output, shape index: {}]  }
   0x1   :  { %3092 = sst [smem:[#allocation22_spill]] %s3071_s0 }
   0x2   :  { %3093 = sst [smem:[#allocation23_spill]] %s3072_s1 }
   0x3   :  { %3094 = sst [smem:[#allocation24_spill]] %s3073_s2 }
   0x4   :  { %3095 = sst [smem:[#allocation25_spill]] %s3074_s3 }
   0x5   :  { %3096 = sst [smem:[#allocation26_spill]] %s3075_s4 }
   0x6   :  { %3097 = sst [smem:[#allocation27_spill]] %s3077_s6 }
   0x7   :  { %3098 = sst [smem:[#allocation28_spill]] %s3078_s7 }
   0x8   :  { %3099 = sst [smem:[#allocation29_spill]] %s3079_s8 }
   0x9   :  { %3100 = sst [smem:[#allocation30_spill]] %s3080_s9 }
   0xa   :  { %3101 = sst [smem:[#allocation31_spill]] %s3081_s10 }
   0xb   :  { %3102 = sst [smem:[#allocation32_spill]] %s3082_s11 }
   0xc   :  { %3103 = sst [smem:[#allocation33_spill]] %s3083_s12 }
   0xd   :  { %3104 = sst [smem:[#allocation34_spill]] %s3084_s13 }
   0xe   :  { %3105 = sst [smem:[#allocation35_spill]] %s3085_s14 }
   0xf   :  { %3106 = sst [smem:[#allocation36_spill]] %s3086_s15 }
  0x10   :  { %3107 = sst [smem:[#allocation37_spill]] %s3087_s16 }
  0x11   :  { %21 = vsyncpa [#allocation4], 0 }
  0x12   :  { %22 = vsyncpa [#allocation7], 0 }
  0x13   :  { %23 = vsyncpa [#allocation5], 0  ;;  %s2655_s21 = smov 0   ;;  %s2657_s22 = smov 0  }
  0x14   :  { %s2659_s23 = smov 0   ;;  %s2661_s24 = smov 0  }
  0x15   :  { %s2663_s25 = smov 0   ;;  %s2665_s26 = smov 0  }
  0x16 LB: > { %3108 = sst [smem:[#allocation17_spill]] %s2534_s23  ;;  %s2684_s27 = sadd.s32 4294967295, %s2546_s26   ;;  %s2546_s26 = sphi %s2665_s26, %s29_s26   ;;  %s2542_s25 = sphi %s2663_s25, %s3146_s25   ;;  %s2538_s24 = sphi %s2661_s24, %s3145_s24   ;;  %s2534_s23 = sphi %s2659_s23, %s3144_s23   ;;  %s2530_s22 = sphi %s2657_s22, %s3148_s22   ;;  %s2526_s21 = sphi %s2655_s21, %s3147_s21  }
  0x17   : > { %3109 = sst [smem:[#allocation18_spill]] %s2542_s25  ;;  %p139_p0 = scmp.ne.s32.totalorder %s2530_s22, %s2526_s21 }
  0x18   : > { %3110 = sst [smem:[#allocation19_spill]] %s2546_s26  ;;  %p140_p1 = scmp.eq.s32.totalorder %s2684_s27, 0 }
  0x19   : > { %p2013_p2 = scmp.ge.s32.totalorder %s2546_s26, 1  ;;  %p488_p3 = scmp.lt.s32.totalorder %s2546_s26, 3 }
  0x1a   : > { %p2692_p4 = por %p140_p1, %p139_p0  ;;  %s3112_s0 = sld [smem:[#allocation22_spill]] }
  0x1b   : > { %p2699_p5 = pnand %p2013_p2, %p488_p3  ;;  %s2548_s19 = smov [#allocation3]  }
  0x1c   : > { %s504_s20 = sshll.u32 %s2548_s19, 4  ;;  %s2549_s29 = smov 128   ;;  %s505_s20 = int_to_ptr.vmem [resolvable:$true] %s504_s20 }
  0x1d   : > { %p2121_p6 = pneg %p2699_p5  ;;  %s2550_s30 = smov 8  }
  0x1e   : > { %s126_s16 = sadd.s32 1, %s2534_s23  ;;  %p133_p9 = scmp.ne.s32.totalorder %s2534_s23, %s2530_s22 }
  0x1f   : > { %p2707_p7 = pnand %p2121_p6, %p140_p1  ;;  %p134_p10 = scmp.eq.s32.totalorder %s2546_s26, 0 }
  0x20   : > { %s502_s17 = sshll.u32 %s3112_s0, 4  ;;  %s38_s0 = sadd.s32 1, %s2542_s25  ;;  %s503_s17 = int_to_ptr.hbm [resolvable:$true] %s502_s17 }
  0x21   : > { %2124 = dma.hbm_to_vmem [thread:$0]  (!%p2707_p7), %s503_s17, 256, %s505_s20, [#allocation4], %s2549_s29, %s2549_s29, %s2550_s30  }
  0x22   : > { %p39_p8 = scmp.ge.s32.totalorder %s38_s0, 2  ;;  %p2720_p11 = por %p134_p10, %p133_p9 }
  0x23   : > { %p2143_p12 = scmp.lt.s32.totalorder %s2546_s26, 2  ;;  %s542_s12 = sand.u32 1, %s2546_s26  }
  0x24   : > { %s3150_s0 = smov (%p39_p8, %s38_s0), 0  ;;  %s2729_s10 = sand.u32 1, %s2534_s23  }
  0x25   : > { %3115 = sst [smem:[#allocation20_spill]] %s3150_s0  ;;  %s123_s14 = ssub.s32 %s2542_s25, %s3150_s0 }
  0x26   : > { %p124_p13 = scmp.eq.s32.totalorder %s123_s14, 0  ;;  %s3117_s3 = sld [smem:[#allocation25_spill]] }
  0x27   : > { %s545_s9 = scalar_lea.vmem [#allocation8], %s2729_s10  ;;  %p2741_p0 = pnand %p2143_p12, %p2720_p11 }
  0x28   : > { %s2736_s30 = scalar_select %p124_p13, %s2534_s23, %s126_s16  }
  0x29   : > { %s552_s7 = sshll.u32 %s545_s9, 4  ;;  %s3120_s11 = sld [smem:[#allocation32_spill]]  ;;  %s553_s7 = int_to_ptr.vmem [resolvable:$true] %s552_s7 }
  0x2a   : > { %3118 = sst [smem:[#allocation21_spill]] %s2736_s30  ;;  %s2749_s20 = scalar_lea.sflag [#allocation4], %s542_s12 }
  0x2b   : > { %s610_s9 = scalar_lea.vmem [#allocation9], %s2729_s10  ;;  %s3121_s13 = sld [smem:[#allocation34_spill]] }
  0x2c   : > { %s548_s29 = scalar_lea.hbm %s3117_s3, %s2542_s25  ;;  %s617_s19 = sshll.u32 %s610_s9, 4  ;;  %s618_s19 = int_to_ptr.vmem [resolvable:$true] %s617_s19 }
  0x2d   : > { %s550_s8 = sshll.u32 %s548_s29, 4  ;;  %s3122_s1 = sld [smem:[#allocation23_spill]]  ;;  %s551_s8 = int_to_ptr.hbm [resolvable:$true] %s550_s8 }
  0x2e   : > { %2131 = dma.hbm_to_vmem [thread:$0]  (!%p2741_p0), %s551_s8, 16, %s553_s7, %s2749_s20  }
  0x2f   : > { %s613_s17 = scalar_lea.hbm %s3120_s11, %s2542_s25  ;;  %s2553_s26 = smov 1  }
  0x30   : > { %s615_s16 = sshll.u32 %s613_s17, 4  ;;  %s633_s17 = scalar_lea.vmem [#allocation10], %s2729_s10  ;;  %s616_s16 = int_to_ptr.hbm [resolvable:$true] %s615_s16 }
  0x31   : > { %2134 = dma.hbm_to_vmem [thread:$0]  (!%p2741_p0), %s616_s16, 16, %s618_s19, %s2749_s20  }
  0x32   : > { %s636_s29 = scalar_lea.hbm %s3121_s13, %s2542_s25  ;;  %s640_s12 = sshll.u32 %s633_s17, 4  ;;  %s641_s12 = int_to_ptr.vmem [resolvable:$true] %s640_s12 }
  0x33   : > { %s638_s3 = sshll.u32 %s636_s29, 4  ;;  %s518_s8 = sshll.u32 %s3122_s1, 4  ;;  %s639_s3 = int_to_ptr.hbm [resolvable:$true] %s638_s3  ;;  %s519_s8 = int_to_ptr.hbm [resolvable:$true] %s518_s8 }
  0x34   : > { %2137 = dma.hbm_to_vmem [thread:$0]  (!%p2741_p0), %s639_s3, 16, %s641_s12, %s2749_s20  }
  0x35   : > { %s2551_s16 = smov [#allocation6]   ;;  %s2552_s19 = smov 16  }
  0x36   : > { %s520_s9 = sshll.u32 %s2551_s16, 4  ;;  %s3123_s15 = sld [smem:[#allocation36_spill]]  ;;  %s521_s9 = int_to_ptr.vmem [resolvable:$true] %s520_s9 }
  0x37   : > { %2127 = dma.hbm_to_vmem [thread:$0]  (!%p2707_p7), %s519_s8, 32, %s521_s9, [#allocation7], %s2552_s19, %s2552_s19, %s2553_s26  }
  0x38   : > { %s656_s30 = scalar_lea.vmem [#allocation11], %s2729_s10 }
  0x39   : > { %s663_s11 = sshll.u32 %s656_s30, 4  ;;  %s664_s11 = int_to_ptr.vmem [resolvable:$true] %s663_s11 }
  0x3a   : > { %672 = sbr.rel (%p2699_p5) target bundleno = 2938 (0xb7a), region = 84 }
  0x3c   : > { %s659_s17 = scalar_lea.hbm %s3123_s15, %s2542_s25 }
  0x3d   : > { %s661_s13 = sshll.u32 %s659_s17, 4  ;;  %s662_s13 = int_to_ptr.hbm [resolvable:$true] %s661_s13 }
  0x3e   : > { %2140 = dma.hbm_to_vmem [thread:$0]  (!%p2741_p0), %s662_s13, 16, %s664_s11, %s2749_s20  }
  0x3f   : > { %2509 = dma.done.wait (%p140_p1), [#allocation4], 256  }
  0x40   : > { %2511 = vsyncadd (%p140_p1), [#allocation4], 4294967040 }
  0x41   : > { %2513 = dma.done.wait (%p140_p1), [#allocation7], 32  }
  0x42   : > { %2515 = vsyncadd (%p140_p1), [#allocation7], 4294967264  ;;  %s684_s3 = sand.u32 1, %s2684_s27   ;;  %s2791_s10 = sand.u32 1, %s2530_s22  }
  0x43   : > { %s685_s13 = scalar_lea.sflag [#allocation4], %s684_s3 }
  0x44   : > { %2517 = dma.done.wait (%p2692_p4), %s685_s13, 64  }
  0x45   : > { %2519 = vsyncadd (%p2692_p4), %s685_s13, 4294967232  ;;  %p810_p2 = scmp.lt.s32.totalorder %s2538_s24, 1  ;;  %s3124_s2 = sld [smem:[#allocation24_spill]] }
  0x46   : > { %s3125_s4 = sld [smem:[#allocation26_spill]]  ;;  %s696_s23 = scalar_lea.vmem [#allocation9], %s2791_s10 }
  0x47   : > { %s2800_s21 = scalar_select %p810_p2, %s2538_s24, 1 }
  0x48   : > { %s3126_s6 = sld [smem:[#allocation27_spill]]  ;;  %s705_s20 = scalar_lea.vmem [#allocation10], %s2791_s10 }
  0x49   : > { %s2089_s30 = sshll.u32 %s2800_s21, 4  ;;  %s2092_s14 = sshll.u32 %s2800_s21, 5 }
  0x4a   : > { %s3128_s18 = sld [smem:[#allocation30_spill]]  ;;  %p2028_p1 = scmp.ne.s32.totalorder %s2538_s24, 0 }
  0x4b   : > { %s814_s8 = scalar_lea.vmem %s3124_s2, %s2089_s30  ;;  %s3129_s2 = sld [smem:[#allocation29_spill]] }
  0x4c   : > { %s2813_s19 = scalar_lea.vmem %s3125_s4, %s2089_s30  ;;  %s3130_s15 = sld [smem:[#allocation31_spill]] }
  0x4d   : > { %s3132_s3 = sld [smem:[#allocation35_spill]] }
  0x4e   : > { %s2818_s29 = scalar_lea.vmem %s3126_s6, %s2089_s30  ;;  %s3131_s6 = sld [smem:[#allocation33_spill]] }
  0x50   : > { %s838_s12 = scalar_lea.vmem %s3128_s18, %s2800_s21  ;;  %s714_s18 = scalar_lea.vmem [#allocation11], %s2791_s10 }
  0x51   : > { %s2832_s16 = scalar_lea.vmem %s3129_s2, %s2092_s14  ;;  %853 = sbr.rel (%p2028_p1) target bundleno = 91 (0x5b), region = 112 }
  0x52   : > { %s841_s26 = scalar_lea.vmem %s3130_s15, %s2800_s21 }
  0x53   : > { %s847_s13 = scalar_lea.vmem %s3132_s3, %s2800_s21 }
  0x54   : > { %s844_s25 = scalar_lea.vmem %s3131_s6, %s2800_s21 }
  0x56   : > { %v854_v0 = vld [vmem:[#allocation3] sm:$0xff]  ;;  %v2218_v1 = vld [vmem:[#allocation6] ss:$0 sm:$0xff]  ;;  %vm866_vm0 = vcmask 261120   ;;  %v855_v2 = vld [vmem:[#allocation3 + $0x8] sm:$0xff] }
  0x57   : > { %v2219_v3 = vld [vmem:[#allocation6 + $0x1] ss:$0 sm:$0xff]  ;;  %v864_v4 = vadd.f32 %v2218_v1, %v854_v0 }
  0x58   : > { %v865_v5 = vadd.f32 %v2219_v3, %v855_v2 }
  0x59   : > { %867 = vst.msk [vmem:[#allocation2] sm:$0xff] %vm866_vm0, %v864_v4 }
  0x5a   : > { %868 = vst.msk [vmem:[#allocation2 + $0x8] sm:$0xff] %vm866_vm0, %v865_v5 }
  0x5b PF: > { %v2094_v6 = vld [vmem:[%s814_s8 + $0x8] sm:$0xff]  ;;  %v2093_v7 = vld [vmem:[%s814_s8] sm:$0xff]  ;;  %vm898_vm1 = vcmask 261120   ;;  %s3133_s1 = scalar_lea.vmem [#allocation8], %s2791_s10  ;;  %s2554_s2 = smov 96   ;;  %vm923_vm2 = vcmask 64512   ;;  %v871_v36 = vlaneseq }
  0x5c   : > { %908 = vmatpush.bf16.msra.mxu0 %v2094_v6  ;;  %v2220_v11 = vld [vmem:[%s3133_s1] ss:$0 sm:$0xff]  ;;  %s2555_s4 = smov 88   ;;  %s2556_s6 = smov 120   ;;  %vm1000_vm3 = vcmask 1043456   ;;  %v2559_v40 = vmov -inf  }
  0x5d   : > { %s2557_s15 = smov 56   ;;  %s2558_s8 = smov 80   ;;  %v872_v37 = vshrl.u32 %v871_v36, 7  ;;  %v874_v38 = vand.u32 127, %v871_v36 }
  0x5e   : > { %s2560_s14 = smov 112   ;;  %s2561_s28 = smov 64  }
  0x5f   : > { %vm875_vm4 = vcmp.le.s32.totalorder %v874_v38, %v872_v37  ;;  %s2562_s7 = smov 48   ;;  %s2563_s9 = smov 72   ;;  %v1157_v37 = vld [vmem:[%s2813_s19 + $0x4] sm:$0xf] }
  0x60   : > { %v2850_v8 = vld [vmem:[#allocation2] sm:$0xff]  ;;  %909 = vmatpush.bf16.msra.mxu0 %v2093_v7  ;;  %v2883_v41 = vsel %vm875_vm4, 0.0, %v2559_v40  ;;  %s2564_s30 = smov 104   ;;  %v1162_v38 = vsel %vm1000_vm3, %v1157_v37, 0  ;;  %s2565_s0 = smov 40  }
  0x61   : > { %v2852_v9 = vld [vmem:[#allocation2 + $0x8] sm:$0xff]  ;;  %s3134_s3 = scalar_lea.vmem %s3076_s5, %s2800_s21  ;;  %p2084_p3 = scmp.ne.s32.totalorder %s2538_s24, 1 }
  0x62   : > { %v877_v10 = vpack.c.bf16 %v2852_v9, %v2850_v8 }
  0x64   : > { %2037 = vmatmul.msk.bf16.vlgmr.msra.gmra.mxu0 %vm898_vm1, %v877_v10 }
  0xe1   : > { %v911_v12 = vpop.f32.mrf.mxu0 }
  0xe2   : > { %v912_v13 = vadd.f32 %v2220_v11, %v911_v12 }
  0xe4   : > { %v916_v14 = vpack.c.bf16 %v912_v13, %v912_v13 }
  0xe6   : > { %v919_v15 = vunpack.c.l.b16 %v916_v14 }
  0xe8   : > { %v2859_v16 = vpack.c.b16 %v919_v15, %v919_v15 }
  0xe9   : > { %v913_v17 = vpop.f32.mrf.mxu0 }
  0xea   : > { %v914_v18 = vadd.f32 %v2220_v11, %v913_v17  ;;  %921 = vrot.lane.b32.xlu1 %v2859_v16, %s2554_s2  ;;  %1042 = vrot.lane.b32.xlu0 %v2859_v16, %s2555_s4 }
  0xec   : > { %v917_v19 = vpack.c.bf16 %v914_v18, %v914_v18 }
  0xee   : > { %v944_v20 = vunpack.c.l.b16 %v917_v19 }
  0xf0   : > { %v2863_v21 = vpack.c.b16 %v944_v20, %v944_v20 }
  0xf2   : > { %1065 = vrot.lane.b32.xlu2 %v2863_v21, %s2555_s4  ;;  %946 = vrot.lane.b32.xlu1 %v2863_v21, %s2554_s2  ;;  %s3137_s4 = sld [smem:[#allocation28_spill]] }
  0xf3   : > { %1040 = vrot.lane.b32.xlu0 %v2859_v16, %s2556_s6 }
  0xfa   : > { %1063 = vrot.lane.b32.xlu2 %v2863_v21, %s2556_s6  ;;  %s3138_s6 = scalar_lea.vmem %s3137_s4, %s2800_s21 }
 0x102   : > { %1114 = vrot.lane.b32.xlu2 %v2859_v16, %s2557_s15 }
 0x10a   : > { %1200 = vrot.lane.b32.xlu2 %v2859_v16, %s2558_s8 }
 0x14c   : > { %v1066_v22 = vpop.permute.xlu2 %1065 }
 0x14d   : > { %v1071_v28 = vsel %vm923_vm2, %v1066_v22, 0 }
 0x154   : > { %v1064_v23 = vpop.permute.xlu2 %1063 }
 0x15c   : > { %v922_v24 = vpop.permute.xlu1 %921  ;;  %v1043_v25 = vpop.permute.xlu0 %1042 }
 0x15d   : > { %v928_v26 = vsel %vm923_vm2, %v922_v24, 0  ;;  %v1048_v27 = vsel %vm923_vm2, %v1043_v25, 0  ;;  %v1115_v29 = vpop.permute.xlu2 %1114 }
 0x15e   : > { %937 = vmatpush.bf16.xpose.msra.mxu1 %v928_v26  ;;  %1057 = vmatpush.bf16.xpose.msrb.mxu0 %v1048_v27  ;;  %v1120_v33 = vsel %vm1000_vm3, %v1115_v29, 0 }
 0x164   : > { %v947_v30 = vpop.permute.xlu1 %946 }
 0x165   : > { %v1041_v31 = vpop.permute.xlu0 %1040  ;;  %2038 = vmatmul.msk.bf16.vlgmr.msra.gmra.mxu1 %vm923_vm2, %v916_v14  ;;  %v952_v32 = vsel %vm923_vm2, %v947_v30, 0  ;;  %v1201_v34 = vpop.permute.xlu2 %1200 }
 0x166   : > { %1080 = vmatpush.bf16.xpose.msrb.mxu1 %v1071_v28  ;;  %2042 = vmatmul.msk.bf16.vlgmr.msrb.gmra.mxu0 %vm923_vm2, %v1041_v31  ;;  %v1206_v35 = vsel %vm923_vm2, %v1201_v34, 0 }
 0x167   : > { %961 = vmatpush.bf16.xpose.msra.mxu2 %v952_v32  ;;  %1171 = vmatpush.bf16.msra.mxu0 %v1162_v38 }
 0x16e   : > { %2039 = vmatmul.msk.bf16.vlgmr.msra.gmra.mxu2 %vm923_vm2, %v917_v19 }
 0x16f   : > { %1129 = vmatpush.bf16.msrb.mxu2 %v1120_v33 }
 0x173   : > { %1215 = vmatpush.bf16.xpose.msra.mxu2 %v1206_v35 }
 0x175   : > { %2043 = vmatmul.msk.bf16.vlgmr.msrb.gmra.mxu1 %vm923_vm2, %v1064_v23 }
 0x1e2   : > { %v939_v39 = vpop.f32.mrf.mxu1 }
 0x1e3   : > { %v967_v42 = vmul.f32 0.35355338, %v939_v39  ;;  %v1059_v43 = vpop.f32.mrf.mxu0 }
 0x1e4   : > { %v1086_v44 = vmul.f32 0.35355338, %v1059_v43 }
 0x1e5   : > { %v969_v45 = vadd.f32 %v967_v42, %v2883_v41 }
 0x1e6   : > { %v1088_v46 = vadd.f32 %v1086_v44, %v2883_v41 }
 0x1e7   : > { %v971_v47 = vsel %vm923_vm2, %v969_v45, -inf }
 0x1e8   : > { %972 = vmax.xlane.f32.xlu2 %v971_v47  ;;  %v1090_v48 = vsel %vm923_vm2, %v1088_v46, -inf }
 0x1e9   : > { %1091 = vmax.xlane.f32.xlu0 %v1090_v48 }
 0x1ea   : > { %v941_v49 = vpop.f32.mrf.mxu1 }
 0x1eb   : > { %v1061_v50 = vpop.f32.mrf.mxu0 }
 0x1f1   : > { %v963_v51 = vpop.f32.mrf.mxu2 }
 0x1f2   : > { %v1082_v52 = vpop.f32.mrf.mxu1  ;;  %v968_v0 = vmul.f32 0.35355338, %v963_v51 }
 0x1f3   : > { %v1087_v3 = vmul.f32 0.35355338, %v1082_v52 }
 0x1f4   : > { %v970_v2 = vadd.f32 %v968_v0, %v2883_v41 }
 0x1f5   : > { %v1089_v5 = vadd.f32 %v1087_v3, %v2883_v41 }
 0x1f6   : > { %v974_v4 = vsel %vm923_vm2, %v970_v2, -inf }
 0x1f7   : > { %v1093_v6 = vsel %vm923_vm2, %v1089_v5, -inf }
 0x1f9   : > { %v965_v53 = vpop.f32.mrf.mxu2 }
 0x1fa   : > { %v1084_v54 = vpop.f32.mrf.mxu1 }
 0x1fd   : > { %1198 = vrot.lane.b32.xlu0 %v2859_v16, %s2560_s14 }
 0x25b   : > { %v973_v55 = vpop.xlane.xlu2 %972 }
 0x25c   : > { %v977_v56 = vsub.f32 %v969_v45, %v973_v55  ;;  %v1092_v57 = vpop.xlane.xlu0 %1091 }
 0x25d   : > { %v1096_v58 = vsub.f32 %v1088_v46, %v1092_v57 }
 0x25e   : > { %v979_v59 = vmul.f32 1.442695, %v977_v56 }
 0x25f   : > { %v1098_v60 = vmul.f32 1.442695, %v1096_v58 }
 0x260   : > { %2230 = vpow2.f32 %v979_v59 }
 0x261   : > { %2232 = vpow2.f32 %v1098_v60 }
 0x266   : > { %v2231_v61 = vpop.eup %2230 }
 0x267   : > { %v2233_v62 = vpop.eup %2232  ;;  %v983_v63 = vsel %vm923_vm2, %v2231_v61, 0.0 }
 0x268   : > { %984 = vadd.xlane.f32.xlu2 %v983_v63  ;;  %v1102_v1 = vsel %vm923_vm2, %v2233_v62, 0.0 }
 0x269   : > { %1103 = vadd.xlane.f32.xlu1 %v1102_v1 }
 0x26f   : > { %v1199_v25 = vpop.permute.xlu0 %1198 }
 0x271   : > { %975 = vmax.xlane.f32.xlu1 %v974_v4 }
 0x279   : > { %1094 = vmax.xlane.f32.xlu1 %v1093_v6 }
 0x280   : > { %1017 = vrot.lane.b32.xlu2 %v2863_v21, %s2561_s28 }
 0x288   : > { %1135 = vrot.lane.b32.xlu2 %v2863_v21, %s2557_s15 }
 0x290   : > { %1223 = vrot.lane.b32.xlu2 %v2863_v21, %s2558_s8 }
 0x292   : > { %995 = vrot.lane.b32.xlu1 %v2859_v16, %s2561_s28 }
 0x2db   : > { %v985_v23 = vpop.xlane.xlu2 %984 }
 0x2dc   : > { %v1104_v7 = vpop.xlane.xlu1 %1103 }
 0x2dd   : > { %2234 = vrcp.f32 %v1104_v7 }
 0x2e3   : > { %v2235_v10 = vpop.eup %2234  ;;  %v1018_v27 = vpop.permute.xlu2 %1017 }
 0x2e4   : > { %v1110_v11 = vmul.f32 %v2235_v10, %v2233_v62  ;;  %v976_v12 = vpop.xlane.xlu1 %975  ;;  %v1023_v33 = vsel %vm1000_vm3, %v1018_v27, 0 }
 0x2e5   : > { %v978_v13 = vsub.f32 %v970_v2, %v976_v12 }
 0x2e6   : > { %v1112_v14 = vpack.c.bf16 %v1110_v11, %v1110_v11 }
 0x2e7   : > { %v981_v15 = vmul.f32 1.442695, %v978_v13 }
 0x2e8   : > { %2044 = vmatmul.msk.bf16.vlgmr.msrb.gmra.mxu2 %vm923_vm2, %v1112_v14 }
 0x2e9   : > { %2236 = vpow2.f32 %v981_v15 }
 0x2eb   : > { %v1136_v32 = vpop.permute.xlu2 %1135 }
 0x2ec   : > { %v1095_v17 = vpop.xlane.xlu1 %1094  ;;  %v1141_v35 = vsel %vm1000_vm3, %v1136_v32, 0 }
 0x2ed   : > { %v1097_v18 = vsub.f32 %v1089_v5, %v1095_v17 }
 0x2ef   : > { %v2237_v19 = vpop.eup %2236  ;;  %v1100_v20 = vmul.f32 1.442695, %v1097_v18 }
 0x2f0   : > { %v986_v22 = vsel %vm923_vm2, %v2237_v19, 0.0 }
 0x2f1   : > { %2238 = vpow2.f32 %v1100_v20  ;;  %987 = vadd.xlane.f32.xlu0 %v986_v22 }
 0x2f2   : > { %2240 = vrcp.f32 %v985_v23 }
 0x2f3   : > { %v1224_v43 = vpop.permute.xlu2 %1223 }
 0x2f4   : > { %v1229_v46 = vsel %vm923_vm2, %v1224_v43, 0 }
 0x2f7   : > { %v2239_v24 = vpop.eup %2238 }
 0x2f8   : > { %2048 = vmatmul.msk.bf16.vlgmr.msra.gmra.mxu2 %vm923_vm2, %v1199_v25  ;;  %v1105_v26 = vsel %vm923_vm2, %v2239_v24, 0.0  ;;  %v2241_v28 = vpop.eup %2240 }
 0x2f9   : > { %1106 = vadd.xlane.f32.xlu1 %v1105_v26  ;;  %v991_v29 = vmul.f32 %v2241_v28, %v2231_v61  ;;  %v1039_v61 = vld [vmem:[%s2813_s19] sm:$0xf] }
 0x2fa   : > { %v1182_v62 = vsel %vm1000_vm3, %v1039_v61, 0 }
 0x2fb   : > { %v993_v34 = vpack.c.bf16 %v991_v29, %v991_v29  ;;  %1191 = vmatpush.bf16.msra.mxu1 %v1182_v62  ;;  %v1315_v62 = vld [vmem:[%s2813_s19 + $0x8] sm:$0xf] }
 0x304   : > { %v996_v30 = vpop.permute.xlu1 %995 }
 0x305   : > { %1221 = vrot.lane.b32.xlu0 %v2863_v21, %s2560_s14  ;;  %v1002_v31 = vsel %vm1000_vm3, %v996_v30, 0 }
 0x306   : > { %1011 = vmatpush.bf16.msra.mxu3 %v1002_v31 }
 0x309   : > { %2040 = vmatmul.msk.bf16.vlgmr.msra.gmra.mxu3 %vm923_vm2, %v993_v34 }
 0x30a   : > { %1032 = vmatpush.bf16.msrb.mxu3 %v1023_v33 }
 0x30e   : > { %1150 = vmatpush.bf16.msra.mxu3 %v1141_v35 }
 0x312   : > { %1272 = vrot.lane.b32.xlu1 %v2859_v16, %s2562_s7 }
 0x31a   : > { %1363 = vrot.lane.b32.xlu1 %v2863_v21, %s2563_s9 }
 0x322   : > { %1338 = vrot.lane.b32.xlu1 %v2859_v16, %s2564_s30 }
 0x364   : > { %v988_v36 = vpop.xlane.xlu0 %987 }
 0x365   : > { %2242 = vrcp.f32 %v988_v36 }
 0x36b   : > { %v2243_v39 = vpop.eup %2242  ;;  %v1131_v40 = vpop.f32.mrf.mxu2 }
 0x36c   : > { %v992_v42 = vmul.f32 %v2243_v39, %v2237_v19  ;;  %v1107_v44 = vpop.xlane.xlu1 %1106 }
 0x36d   : > { %2244 = vrcp.f32 %v1107_v44 }
 0x36e   : > { %v994_v45 = vpack.c.bf16 %v992_v42, %v992_v42 }
 0x370   : > { %2041 = vmatmul.msk.bf16.vlgmr.msrb.gmra.mxu3 %vm923_vm2, %v994_v45 }
 0x371   : > { %1238 = vmatpush.bf16.xpose.msrb.mxu3 %v1229_v46 }
 0x373   : > { %v1133_v47 = vpop.f32.mrf.mxu2  ;;  %v2245_v48 = vpop.eup %2244 }
 0x374   : > { %v1111_v49 = vmul.f32 %v2245_v48, %v2239_v24 }
 0x376   : > { %v1113_v52 = vpack.c.bf16 %v1111_v49, %v1111_v49 }
 0x377   : > { %v1222_v59 = vpop.permute.xlu0 %1221 }
 0x37b   : > { %v1217_v50 = vpop.f32.mrf.mxu2 }
 0x37c   : > { %v1244_v51 = vmul.f32 0.35355338, %v1217_v50 }
 0x37e   : > { %v1246_v53 = vadd.f32 %v1244_v51, %v2883_v41 }
 0x380   : > { %2045 = vmatmul.msk.bf16.vlgmr.msra.gmra.mxu3 %vm923_vm2, %v1113_v52  ;;  %v1248_v54 = vsel %vm923_vm2, %v1246_v53, -inf }
 0x381   : > { %1249 = vmax.xlane.f32.xlu2 %v1248_v54 }
 0x383   : > { %v1219_v55 = vpop.f32.mrf.mxu2 }
 0x384   : > { %v1273_v56 = vpop.permute.xlu1 %1272 }
 0x385   : > { %v1278_v57 = vsel %vm1000_vm3, %v1273_v56, 0 }
 0x386   : > { %1287 = vmatpush.bf16.msrb.mxu0 %v1278_v57 }
 0x38c   : > { %v1013_v58 = vpop.f32.mrf.mxu3  ;;  %v1364_v4 = vpop.permute.xlu1 %1363 }
 0x38d   : > { %v1369_v15 = vsel %vm923_vm2, %v1364_v4, 0 }
 0x390   : > { %2049 = vmatmul.msk.bf16.vlgmr.msrb.gmra.mxu3 %vm923_vm2, %v1222_v59 }
 0x394   : > { %v1015_v60 = vpop.f32.mrf.mxu3  ;;  %v1339_v13 = vpop.permute.xlu1 %1338 }
 0x399   : > { %1340 = vrot.lane.b32.xlu2 %v2859_v16, %s2563_s9 }
 0x3f3   : > { %v1034_v63 = vpop.f32.mrf.mxu3 }
 0x3f4   : > { %v1038_v0 = vpack.c.bf16 %v1034_v63, %v1013_v58  ;;  %v1250_v1 = vpop.xlane.xlu2 %1249  ;;  %v1320_v63 = vsel %vm1000_vm3, %v1315_v62, 0 }
 0x3f5   : > { %v1254_v2 = vsub.f32 %v1246_v53, %v1250_v1  ;;  %1329 = vmatpush.bf16.msrb.mxu2 %v1320_v63 }
 0x3f6   : > { %2047 = vmatmul.msk.bf16.vlgmr.msra.gmra.mxu1 %vm923_vm2, %v1038_v0 }
 0x3f7   : > { %v1256_v3 = vmul.f32 1.442695, %v1254_v2 }
 0x3f9   : > { %2246 = vpow2.f32 %v1256_v3 }
 0x3fb   : > { %v1036_v5 = vpop.f32.mrf.mxu3 }
 0x3fc   : > { %v1341_v6 = vpop.permute.xlu2 %1340 }
 0x3fd   : > { %v1346_v7 = vsel %vm923_vm2, %v1341_v6, 0 }
 0x3fe   : > { %1355 = vmatpush.bf16.xpose.msra.mxu3 %v1346_v7 }
 0x3ff   : > { %v2247_v10 = vpop.eup %2246 }
 0x400   : > { %v1260_v11 = vsel %vm923_vm2, %v2247_v10, 0.0 }
 0x401   : > { %1261 = vadd.xlane.f32.xlu0 %v1260_v11 }
 0x403   : > { %v1152_v12 = vpop.f32.mrf.mxu3 }
 0x404   : > { %v1156_v14 = vpack.c.bf16 %v1152_v12, %v1131_v40 }
 0x405   : > { %2053 = vmatmul.msk.bf16.vlgmr.msra.gmra.mxu3 %vm923_vm2, %v1339_v13 }
 0x406   : > { %2046 = vmatmul.msk.bf16.vlgmr.msra.gmra.mxu0 %vm923_vm2, %v1156_v14 }
 0x407   : > { %1378 = vmatpush.bf16.xpose.msra.mxu0 %v1369_v15 }
 0x40b   : > { %v1154_v17 = vpop.f32.mrf.mxu3 }
 0x413   : > { %v1240_v18 = vpop.f32.mrf.mxu3 }
 0x414   : > { %v1245_v19 = vmul.f32 0.35355338, %v1240_v18 }
 0x415   : > { %1361 = vrot.lane.b32.xlu0 %v2863_v21, %s2564_s30 }
 0x416   : > { %v1247_v20 = vadd.f32 %v1245_v19, %v2883_v41 }
 0x418   : > { %v1251_v22 = vsel %vm923_vm2, %v1247_v20, -inf }
 0x419   : > { %1252 = vmax.xlane.f32.xlu1 %v1251_v22 }
 0x41b   : > { %v1242_v23 = vpop.f32.mrf.mxu3 }
 0x41d   : > { %1293 = vrot.lane.b32.xlu0 %v2863_v21, %s2562_s7 }
 0x473   : > { %v1193_v28 = vpop.f32.mrf.mxu1 }
 0x474   : > { %v1262_v24 = vpop.xlane.xlu0 %1261 }
 0x475   : > { %2248 = vrcp.f32 %v1262_v24 }
 0x47b   : > { %v2249_v25 = vpop.eup %2248  ;;  %v1195_v3 = vpop.f32.mrf.mxu1 }
 0x47c   : > { %v1268_v26 = vmul.f32 %v2249_v25, %v2247_v10 }
 0x47e   : > { %v1270_v27 = vpack.c.bf16 %v1268_v26, %v1268_v26 }
 0x480   : > { %2050 = vmatmul.msk.bf16.vlgmr.msrb.gmra.mxu0 %vm923_vm2, %v1270_v27  ;;  %v1455_v27 = vld [vmem:[%s2813_s19 + $0xc] sm:$0xf] }
 0x483   : > { %v1173_v29 = vpop.f32.mrf.mxu0 }
 0x484   : > { %v2945_v30 = vadd.f32 %v1193_v28, %v1173_v29 }
 0x487   : > { %v1362_v31 = vpop.permute.xlu0 %1361 }
 0x488   : > { %v1357_v32 = vpop.f32.mrf.mxu3 }
 0x489   : > { %v1384_v33 = vmul.f32 0.35355338, %v1357_v32 }
 0x48b   : > { %v1386_v34 = vadd.f32 %v1384_v33, %v2883_v41  ;;  %v2952_v45 = vpop.f32.mrf.mxu0  ;;  %v2221_v33 = vld [vmem:[%s3134_s3] ss:$0 sm:$0xff] }
 0x48c   : > { %v1253_v35 = vpop.xlane.xlu1 %1252 }
 0x48d   : > { %v1255_v36 = vsub.f32 %v1247_v20, %v1253_v35  ;;  %v1388_v37 = vsel %vm923_vm2, %v1386_v34, -inf }
 0x48e   : > { %1389 = vmax.xlane.f32.xlu1 %v1388_v37 }
 0x48f   : > { %v1258_v38 = vmul.f32 1.442695, %v1255_v36  ;;  %v1294_v39 = vpop.permute.xlu0 %1293 }
 0x490   : > { %v1299_v40 = vsel %vm1000_vm3, %v1294_v39, 0  ;;  %v1359_v42 = vpop.f32.mrf.mxu3  ;;  %2054 = vmatmul.msk.bf16.vlgmr.msra.gmra.mxu0 %vm923_vm2, %v1362_v31 }
 0x491   : > { %2250 = vpow2.f32 %v1258_v38  ;;  %1308 = vmatpush.bf16.msrb.mxu1 %v1299_v40 }
 0x497   : > { %v2251_v43 = vpop.eup %2250 }
 0x498   : > { %v1263_v44 = vsel %vm923_vm2, %v2251_v43, 0.0 }
 0x499   : > { %1264 = vadd.xlane.f32.xlu2 %v1263_v44 }
 0x4fd   : > { %v1289_v46 = vpop.f32.mrf.mxu0 }
 0x501   : > { %v1390_v47 = vpop.xlane.xlu1 %1389 }
 0x502   : > { %v1394_v48 = vsub.f32 %v1386_v34, %v1390_v47  ;;  %v2566_v47 = vmov 32.0  }
 0x504   : > { %v1396_v49 = vmul.f32 1.442695, %v1394_v48 }
 0x505   : > { %v1291_v50 = vpop.f32.mrf.mxu0 }
 0x506   : > { %2252 = vpow2.f32 %v1396_v49 }
 0x50c   : > { %v2253_v51 = vpop.eup %2252  ;;  %v1265_v52 = vpop.xlane.xlu2 %1264 }
 0x50d   : > { %2254 = vrcp.f32 %v1265_v52  ;;  %v1380_v53 = vpop.f32.mrf.mxu0  ;;  %v1400_v54 = vsel %vm923_vm2, %v2253_v51, 0.0 }
 0x50e   : > { %v1385_v55 = vmul.f32 0.35355338, %v1380_v53  ;;  %1401 = vadd.xlane.f32.xlu1 %v1400_v54 }
 0x510   : > { %v1387_v56 = vadd.f32 %v1385_v55, %v2883_v41 }
 0x512   : > { %v1391_v57 = vsel %vm923_vm2, %v1387_v56, -inf }
 0x513   : > { %v2255_v58 = vpop.eup %2254  ;;  %1392 = vmax.xlane.f32.xlu0 %v1391_v57 }
 0x514   : > { %v1269_v59 = vmul.f32 %v2255_v58, %v2251_v43 }
 0x515   : > { %v1382_v60 = vpop.f32.mrf.mxu0 }
 0x516   : > { %v1271_v61 = vpack.c.bf16 %v1269_v59, %v1269_v59 }
 0x518   : > { %2051 = vmatmul.msk.bf16.vlgmr.msrb.gmra.mxu1 %vm923_vm2, %v1271_v61 }
 0x527   : > { %1412 = vrot.lane.b32.xlu1 %v2859_v16, %s2565_s0 }
 0x581   : > { %v1402_v41 = vpop.xlane.xlu1 %1401 }
 0x586   : > { %v1393_v0 = vpop.xlane.xlu0 %1392 }
 0x587   : > { %v1395_v1 = vsub.f32 %v1387_v56, %v1393_v0 }
 0x589   : > { %v1398_v2 = vmul.f32 1.442695, %v1395_v1 }
 0x58b   : > { %2256 = vpow2.f32 %v1398_v2 }
 0x58c   : > { %2258 = vrcp.f32 %v1402_v41 }
 0x591   : > { %v2257_v4 = vpop.eup %2256 }
 0x592   : > { %v1403_v5 = vsel %vm923_vm2, %v2257_v4, 0.0  ;;  %v2259_v6 = vpop.eup %2258 }
 0x593   : > { %1404 = vadd.xlane.f32.xlu2 %v1403_v5  ;;  %v1408_v11 = vmul.f32 %v2259_v6, %v2253_v51 }
 0x595   : > { %v1310_v7 = vpop.f32.mrf.mxu1  ;;  %v1410_v13 = vpack.c.bf16 %v1408_v11, %v1408_v11 }
 0x596   : > { %v1314_v10 = vpack.c.bf16 %v1310_v7, %v1289_v46 }
 0x598   : > { %2052 = vmatmul.msk.bf16.vlgmr.msrb.gmra.mxu2 %vm923_vm2, %v1314_v10 }
 0x599   : > { %v1413_v16 = vpop.permute.xlu1 %1412 }
 0x59a   : > { %v1418_v12 = vsel %vm1000_vm3, %v1413_v16, 0  ;;  %v2222_v16 = vld [vmem:[%s841_s26] ss:$0 sm:$0xff] }
 0x59b   : > { %1427 = vmatpush.bf16.msra.mxu1 %v1418_v12 }
 0x59d   : > { %v1312_v14 = vpop.f32.mrf.mxu1 }
 0x59e   : > { %2055 = vmatmul.msk.bf16.vlgmr.msra.gmra.mxu1 %vm923_vm2, %v1410_v13 }
 0x5ab   : > { %1433 = vrot.lane.b32.xlu2 %v2863_v21, %s2565_s0  ;;  %v1460_v21 = vsel %vm1000_vm3, %v1455_v27, 0 }
 0x5ac   : > { %1469 = vmatpush.bf16.msrb.mxu3 %v1460_v21 }
 0x606   : > { %v1405_v15 = vpop.xlane.xlu2 %1404 }
 0x607   : > { %2260 = vrcp.f32 %v1405_v15  ;;  %v2223_v15 = vld [vmem:[%s696_s23] ss:$0 sm:$0xff] }
 0x608   : > { %2262 = vrcp.f32 %v2566_v47 }
 0x60d   : > { %v2261_v17 = vpop.eup %2260 }
 0x60e   : > { %v1409_v18 = vmul.f32 %v2261_v17, %v2257_v4  ;;  %v1434_v19 = vpop.permute.xlu2 %1433  ;;  %v2263_v48 = vpop.eup %2262 }
 0x60f   : > { %v1439_v20 = vsel %vm1000_vm3, %v1434_v19, 0  ;;  %v1495_v49 = vmul.f32 32.0, %v2263_v48  ;;  %vm1499_vm5 = vweird.f32 %v2263_v48  ;;  %vm1682_vm3 = vcmask 523264  }
 0x610   : > { %v1411_v22 = vpack.c.bf16 %v1409_v18, %v1409_v18  ;;  %1448 = vmatpush.bf16.msra.mxu2 %v1439_v20 }
 0x611   : > { %v1496_v50 = vsub.f32 1.0, %v1495_v49 }
 0x613   : > { %2056 = vmatmul.msk.bf16.vlgmr.msra.gmra.mxu2 %vm923_vm2, %v1411_v22 }
 0x61b   : > { %v1331_v23 = vpop.f32.mrf.mxu2  ;;  %v1429_v24 = vpop.f32.mrf.mxu1 }
 0x61c   : > { %v1336_v25 = vadd.f32 %v1331_v23, %v2945_v30  ;;  %v1196_v30 = vadd.f32 %v1195_v3, %v2952_v45  ;;  %v1497_v45 = vmul.f32 %v2263_v48, %v1496_v50 }
 0x61e   : > { %v1498_v51 = vadd.f32 %v2263_v48, %v1497_v45 }
 0x623   : > { %v1431_v26 = vpop.f32.mrf.mxu1  ;;  %v1333_v28 = vpop.f32.mrf.mxu2 }
 0x624   : > { %v1337_v38 = vadd.f32 %v1333_v28, %v1196_v30 }
 0x696   : > { %v1450_v29 = vpop.f32.mrf.mxu2 }
 0x697   : > { %v1454_v31 = vpack.c.bf16 %v1450_v29, %v1429_v24 }
 0x699   : > { %2057 = vmatmul.msk.bf16.vlgmr.msrb.gmra.mxu3 %vm923_vm2, %v1454_v31 }
 0x69e   : > { %v1452_v32 = vpop.f32.mrf.mxu2 }
 0x71c   : > { %v1471_v34 = vpop.f32.mrf.mxu3 }
 0x71d   : > { %v1476_v35 = vadd.f32 %v1471_v34, %v1336_v25 }
 0x71f   : > { %v1482_v36 = vadd.f32 %v2221_v33, %v1476_v35 }
 0x721   : > { %v1484_v37 = vadd.f32 %v1482_v36, %v2850_v8  ;;  %v2982_v8 = vsel %vm1499_vm5, %v2263_v48, %v1498_v51 }
 0x723   : > { %v1488_v39 = vsel %vm898_vm1, %v1484_v37, 0.0 }
 0x724   : > { %1489 = vadd.xlane.f32.xlu0 %v1488_v39  ;;  %v1473_v40 = vpop.f32.mrf.mxu3 }
 0x725   : > { %v1477_v42 = vadd.f32 %v1473_v40, %v1337_v38  ;;  %v2096_v38 = vld [vmem:[%s2818_s29 + $0x8] sm:$0xff] }
 0x726   : > { %1635 = vmatpush.bf16.msrb.mxu0 %v2096_v38 }
 0x727   : > { %v1483_v43 = vadd.f32 %v2221_v33, %v1477_v42 }
 0x729   : > { %v1485_v44 = vadd.f32 %v1483_v43, %v2852_v9  ;;  %v2095_v43 = vld [vmem:[%s2818_s29] sm:$0xff] }
 0x72a   : > { %1636 = vmatpush.bf16.msrb.mxu0 %v2095_v43 }
 0x72b   : > { %v1491_v46 = vsel %vm898_vm1, %v1485_v44, 0.0 }
 0x72c   : > { %1492 = vadd.xlane.f32.xlu2 %v1491_v46 }
 0x797   : > { %v1490_v52 = vpop.xlane.xlu0 %1489 }
 0x798   : > { %v1501_v53 = vmul.f32 %v2982_v8, %v1490_v52 }
 0x79a   : > { %v1503_v54 = vsub.f32 %v1484_v37, %v1501_v53 }
 0x79c   : > { %v1505_v55 = vmul.f32 %v1503_v54, %v1503_v54 }
 0x79e   : > { %v1507_v9 = vsel %vm898_vm1, %v1505_v55, 0.0 }
 0x79f   : > { %1508 = vadd.xlane.f32.xlu0 %v1507_v9  ;;  %v1493_v56 = vpop.xlane.xlu2 %1492 }
 0x7a0   : > { %v1502_v57 = vmul.f32 %v2982_v8, %v1493_v56 }
 0x7a2   : > { %v1504_v58 = vsub.f32 %v1485_v44, %v1502_v57 }
 0x7a4   : > { %v1506_v59 = vmul.f32 %v1504_v58, %v1504_v58 }
 0x7a6   : > { %v1510_v60 = vsel %vm898_vm1, %v1506_v59, 0.0 }
 0x7a7   : > { %1511 = vadd.xlane.f32.xlu1 %v1510_v60 }
 0x812   : > { %v1509_v61 = vpop.xlane.xlu0 %1508 }
 0x813   : > { %v1513_v62 = vmul.f32 %v1509_v61, %v2982_v8 }
 0x815   : > { %v1515_v63 = vadd.f32 1e-05, %v1513_v62  ;;  %v2225_v62 = vld [vmem:[%s705_s20] ss:$0 sm:$0xff] }
 0x817   : > { %2264 = vrsqrt.f32 %v1515_v63  ;;  %vm1523_vm7 = vweird.f32 %v1515_v63 }
 0x81a   : > { %v1512_v0 = vpop.xlane.xlu1 %1511 }
 0x81b   : > { %v1514_v1 = vmul.f32 %v1512_v0, %v2982_v8 }
 0x81d   : > { %v2265_v2 = vpop.eup %2264  ;;  %v1516_v41 = vadd.f32 1e-05, %v1514_v1 }
 0x81e   : > { %v1518_v3 = vmul.f32 %v2265_v2, %v1515_v63  ;;  %vm1524_vm6 = vweird.f32 %v2265_v2 }
 0x81f   : > { %2266 = vrsqrt.f32 %v1516_v41  ;;  %vm1525_vm8 = vmor %vm1523_vm7, %vm1524_vm6  ;;  %vm1533_vm10 = vweird.f32 %v1516_v41 }
 0x820   : > { %v1519_v4 = vmul.f32 %v2265_v2, %v1518_v3 }
 0x822   : > { %v1520_v5 = vmul.f32 0.5, %v1519_v4  ;;  %v2100_v4 = vld [vmem:[%s2832_s16 + $0x18] sm:$0xff] }
 0x823   : > { %1690 = vmatpush.bf16.msrb.mxu1 %v2100_v4 }
 0x824   : > { %v1521_v6 = vsub.f32 1.5, %v1520_v5  ;;  %v2099_v5 = vld [vmem:[%s2832_s16 + $0x10] sm:$0xff] }
 0x825   : > { %v2267_v7 = vpop.eup %2266 }
 0x826   : > { %v1522_v10 = vmul.f32 %v2265_v2, %v1521_v6  ;;  %v1528_v11 = vmul.f32 %v2267_v7, %v1516_v41  ;;  %vm1534_vm9 = vweird.f32 %v2267_v7  ;;  %v2098_v6 = vld [vmem:[%s2832_s16 + $0x8] sm:$0xff] }
 0x827   : > { %vm1535_vm11 = vmor %vm1533_vm10, %vm1534_vm9  ;;  %1691 = vmatpush.bf16.msrb.mxu1 %v2099_v5 }
 0x828   : > { %v1529_v12 = vmul.f32 %v2267_v7, %v1528_v11  ;;  %v1526_v13 = vsel %vm1525_vm8, %v2265_v2, %v1522_v10  ;;  %v2226_v11 = vld [vmem:[%s3138_s6] ss:$0 sm:$0xff] }
 0x829   : > { %v1537_v14 = vmul.f32 %v1526_v13, %v1503_v54 }
 0x82a   : > { %v1530_v17 = vmul.f32 0.5, %v1529_v12 }
 0x82b   : > { %v1542_v18 = vmul.f32 %v2222_v16, %v1537_v14  ;;  %1692 = vmatpush.bf16.msrb.mxu1 %v2098_v6 }
 0x82c   : > { %v1531_v19 = vsub.f32 1.5, %v1530_v17 }
 0x82d   : > { %v1547_v20 = vadd.f32 %v2223_v15, %v1542_v18  ;;  %v2227_v18 = vld [vmem:[%s838_s12] ss:$0 sm:$0xff] }
 0x82e   : > { %v1532_v22 = vmul.f32 %v2267_v7, %v1531_v19 }
 0x82f   : > { %v1551_v23 = vsel %vm898_vm1, %v1547_v20, 0.0 }
 0x830   : > { %1552 = vadd.xlane.f32.xlu0 %v1551_v23  ;;  %v1536_v24 = vsel %vm1535_vm11, %v2267_v7, %v1532_v22  ;;  %v2097_v7 = vld [vmem:[%s2832_s16] sm:$0xff] }
 0x831   : > { %v1538_v25 = vmul.f32 %v1536_v24, %v1504_v58  ;;  %v2224_v58 = vld [vmem:[%s844_s25] ss:$0 sm:$0xff]  ;;  %1693 = vmatpush.bf16.msrb.mxu1 %v2097_v7 }
 0x833   : > { %v1543_v26 = vmul.f32 %v2222_v16, %v1538_v25 }
 0x835   : > { %v1548_v27 = vadd.f32 %v2223_v15, %v1543_v26 }
 0x837   : > { %v1554_v21 = vsel %vm898_vm1, %v1548_v27, 0.0 }
 0x838   : > { %1555 = vadd.xlane.f32.xlu0 %v1554_v21 }
 0x8a3   : > { %v1553_v28 = vpop.xlane.xlu0 %1552 }
 0x8a4   : > { %v1557_v29 = vmul.f32 %v1553_v28, %v2982_v8 }
 0x8a6   : > { %v1559_v31 = vsub.f32 %v1547_v20, %v1557_v29 }
 0x8a8   : > { %v1561_v32 = vmul.f32 %v1559_v31, %v1559_v31 }
 0x8aa   : > { %v1563_v33 = vsel %vm898_vm1, %v1561_v32, 0.0 }
 0x8ab   : > { %1564 = vadd.xlane.f32.xlu0 %v1563_v33  ;;  %v1556_v34 = vpop.xlane.xlu0 %1555 }
 0x8ac   : > { %v1558_v35 = vmul.f32 %v1556_v34, %v2982_v8 }
 0x8ae   : > { %v1560_v36 = vsub.f32 %v1548_v27, %v1558_v35 }
 0x8b0   : > { %v1562_v30 = vmul.f32 %v1560_v36, %v1560_v36 }
 0x8b2   : > { %v1566_v37 = vsel %vm898_vm1, %v1562_v30, 0.0 }
 0x8b3   : > { %1567 = vadd.xlane.f32.xlu0 %v1566_v37 }
 0x91e   : > { %v1565_v39 = vpop.xlane.xlu0 %1564 }
 0x91f   : > { %v1569_v40 = vmul.f32 %v1565_v39, %v2982_v8 }
 0x921   : > { %v1571_v42 = vadd.f32 1e-05, %v1569_v40 }
 0x923   : > { %2268 = vrsqrt.f32 %v1571_v42  ;;  %vm1579_vm13 = vweird.f32 %v1571_v42 }
 0x926   : > { %v1568_v44 = vpop.xlane.xlu0 %1567 }
 0x927   : > { %v1570_v46 = vmul.f32 %v1568_v44, %v2982_v8 }
 0x929   : > { %v2269_v47 = vpop.eup %2268  ;;  %v1572_v48 = vadd.f32 1e-05, %v1570_v46 }
 0x92a   : > { %v1574_v49 = vmul.f32 %v2269_v47, %v1571_v42  ;;  %vm1580_vm12 = vweird.f32 %v2269_v47 }
 0x92b   : > { %2270 = vrsqrt.f32 %v1572_v48  ;;  %vm1581_vm14 = vmor %vm1579_vm13, %vm1580_vm12  ;;  %vm1589_vm0 = vweird.f32 %v1572_v48 }
 0x92c   : > { %v1575_v50 = vmul.f32 %v2269_v47, %v1574_v49 }
 0x92e   : > { %v1576_v45 = vmul.f32 0.5, %v1575_v50 }
 0x930   : > { %v1577_v51 = vsub.f32 1.5, %v1576_v45 }
 0x931   : > { %v2271_v52 = vpop.eup %2270 }
 0x932   : > { %v1578_v53 = vmul.f32 %v2269_v47, %v1577_v51  ;;  %v1584_v54 = vmul.f32 %v2271_v52, %v1572_v48  ;;  %vm1590_vm15 = vweird.f32 %v2271_v52 }
 0x933   : > { %vm1591_vm2 = vmor %vm1589_vm0, %vm1590_vm15 }
 0x934   : > { %v1585_v55 = vmul.f32 %v2271_v52, %v1584_v54  ;;  %v1582_v9 = vsel %vm1581_vm14, %v2269_v47, %v1578_v53  ;;  %v2229_v54 = vld [vmem:[%s714_s18] ss:$0 sm:$0xff] }
 0x935   : > { %v1593_v59 = vmul.f32 %v1582_v9, %v1559_v31 }
 0x936   : > { %v1586_v56 = vmul.f32 0.5, %v1585_v55 }
 0x937   : > { %v1598_v63 = vmul.f32 %v2224_v58, %v1593_v59 }
 0x938   : > { %v1587_v57 = vsub.f32 1.5, %v1586_v56 }
 0x939   : > { %v1603_v2 = vadd.f32 %v2225_v62, %v1598_v63 }
 0x93a   : > { %v1588_v60 = vmul.f32 %v2271_v52, %v1587_v57 }
 0x93c   : > { %v1592_v61 = vsel %vm1591_vm2, %v2271_v52, %v1588_v60  ;;  %v2228_v52 = vld [vmem:[%s847_s13] ss:$0 sm:$0xff] }
 0x93d   : > { %v1594_v0 = vmul.f32 %v1592_v61, %v1560_v36 }
 0x93f   : > { %v1599_v1 = vmul.f32 %v2224_v58, %v1594_v0 }
 0x941   : > { %v1604_v41 = vadd.f32 %v2225_v62, %v1599_v1 }
 0x943   : > { %v1605_v3 = vpack.c.bf16 %v1604_v41, %v1603_v2 }
 0x945   : > { %2066 = vmatmul.msk.bf16.vlgmr.msrb.gmra.mxu0 %vm898_vm1, %v1605_v3 }
 0x9c2   : > { %v1638_v10 = vpop.f32.mrf.mxu0 }
 0x9c3   : > { %v1639_v16 = vadd.f32 %v2226_v11, %v1638_v10 }
 0x9c5   : > { %v1643_v14 = vmax.f32 %v1639_v16, 0.0 }
 0x9ca   : > { %v1640_v12 = vpop.f32.mrf.mxu0 }
 0x9cb   : > { %v1641_v13 = vadd.f32 %v2226_v11, %v1640_v12 }
 0x9cd   : > { %v1644_v15 = vmax.f32 %v1641_v13, 0.0 }
 0x9cf   : > { %v1645_v17 = vpack.c.bf16 %v1644_v15, %v1643_v14 }
 0x9d1   : > { %2083 = vmatmul.msk.bf16.vlgmr.msrb.gmra.mxu1 %vm1682_vm3, %v1645_v17 }
 0xa4e   : > { %v1695_v19 = vpop.f32.mrf.mxu1 }
 0xa4f   : > { %v1696_v20 = vadd.f32 %v2227_v18, %v1695_v19 }
 0xa51   : > { %v1700_v22 = vadd.f32 %v1696_v20, %v1603_v2 }
 0xa53   : > { %v1704_v23 = vsel %vm898_vm1, %v1700_v22, 0.0 }
 0xa54   : > { %1705 = vadd.xlane.f32.xlu0 %v1704_v23 }
 0xa56   : > { %v1697_v24 = vpop.f32.mrf.mxu1 }
 0xa57   : > { %v1698_v25 = vadd.f32 %v2227_v18, %v1697_v24 }
 0xa59   : > { %v1701_v26 = vadd.f32 %v1698_v25, %v1604_v41 }
 0xa5b   : > { %v1707_v27 = vsel %vm898_vm1, %v1701_v26, 0.0 }
 0xa5c   : > { %1708 = vadd.xlane.f32.xlu2 %v1707_v27 }
 0xac7   : > { %v1706_v21 = vpop.xlane.xlu0 %1705 }
 0xac8   : > { %v1710_v28 = vmul.f32 %v1706_v21, %v2982_v8 }
 0xaca   : > { %v1712_v29 = vsub.f32 %v1700_v22, %v1710_v28 }
 0xacc   : > { %v1714_v31 = vmul.f32 %v1712_v29, %v1712_v29 }
 0xace   : > { %v1716_v32 = vsel %vm898_vm1, %v1714_v31, 0.0 }
 0xacf   : > { %v1709_v33 = vpop.xlane.xlu2 %1708  ;;  %1717 = vadd.xlane.f32.xlu1 %v1716_v32 }
 0xad0   : > { %v1711_v34 = vmul.f32 %v1709_v33, %v2982_v8 }
 0xad2   : > { %v1713_v35 = vsub.f32 %v1701_v26, %v1711_v34 }
 0xad4   : > { %v1715_v36 = vmul.f32 %v1713_v35, %v1713_v35 }
 0xad6   : > { %v1719_v30 = vsel %vm898_vm1, %v1715_v36, 0.0 }
 0xad7   : > { %1720 = vadd.xlane.f32.xlu0 %v1719_v30 }
 0xb42   : > { %v1718_v37 = vpop.xlane.xlu1 %1717 }
 0xb43   : > { %v1722_v38 = vmul.f32 %v1718_v37, %v2982_v8 }
 0xb45   : > { %v1724_v39 = vadd.f32 1e-05, %v1722_v38 }
 0xb47   : > { %2272 = vrsqrt.f32 %v1724_v39  ;;  %vm1732_vm5 = vweird.f32 %v1724_v39 }
 0xb4a   : > { %v1721_v40 = vpop.xlane.xlu0 %1720 }
 0xb4b   : > { %v1723_v42 = vmul.f32 %v1721_v40, %v2982_v8 }
 0xb4d   : > { %v2273_v43 = vpop.eup %2272  ;;  %v1725_v44 = vadd.f32 1e-05, %v1723_v42 }
 0xb4e   : > { %v1727_v46 = vmul.f32 %v2273_v43, %v1724_v39  ;;  %vm1733_vm4 = vweird.f32 %v2273_v43 }
 0xb4f   : > { %2274 = vrsqrt.f32 %v1725_v44  ;;  %vm1734_vm6 = vmor %vm1732_vm5, %vm1733_vm4  ;;  %vm1742_vm8 = vweird.f32 %v1725_v44 }
 0xb50   : > { %v1728_v47 = vmul.f32 %v2273_v43, %v1727_v46 }
 0xb52   : > { %v1729_v48 = vmul.f32 0.5, %v1728_v47 }
 0xb54   : > { %v1730_v49 = vsub.f32 1.5, %v1729_v48 }
 0xb55   : > { %v2275_v50 = vpop.eup %2274 }
 0xb56   : > { %v1731_v45 = vmul.f32 %v2273_v43, %v1730_v49  ;;  %v1737_v51 = vmul.f32 %v2275_v50, %v1725_v44  ;;  %vm1743_vm7 = vweird.f32 %v2275_v50 }
 0xb57   : > { %vm1744_vm9 = vmor %vm1742_vm8, %vm1743_vm7 }
 0xb58   : > { %v1735_v8 = vsel %vm1734_vm6, %v2273_v43, %v1731_v45  ;;  %v1738_v53 = vmul.f32 %v2275_v50, %v1737_v51 }
 0xb59   : > { %v1746_v55 = vmul.f32 %v1735_v8, %v1712_v29 }
 0xb5a   : > { %v1739_v9 = vmul.f32 0.5, %v1738_v53 }
 0xb5b   : > { %v1751_v56 = vmul.f32 %v2228_v52, %v1746_v55 }
 0xb5c   : > { %v1740_v57 = vsub.f32 1.5, %v1739_v9 }
 0xb5d   : > { %v1756_v58 = vadd.f32 %v2229_v54, %v1751_v56 }
 0xb5e   : > { %v1741_v59 = vmul.f32 %v2275_v50, %v1740_v57 }
 0xb5f   : > { %1758 = vst.msk [vmem:[#allocation2] sm:$0xff] %vm898_vm1, %v1756_v58 }
 0xb60   : > { %v1745_v60 = vsel %vm1744_vm9, %v2275_v50, %v1741_v59 }
 0xb61   : > { %v1747_v61 = vmul.f32 %v1745_v60, %v1713_v35 }
 0xb63   : > { %v1752_v62 = vmul.f32 %v2228_v52, %v1747_v61  ;;  %1763 = sbr.rel (%p2084_p3) target bundleno = 2928 (0xb70), region = 116 }
 0xb65   : > { %v1757_v63 = vadd.f32 %v2229_v54, %v1752_v62 }
 0xb67   : > { %1759 = vst.msk [vmem:[#allocation2 + $0x8] sm:$0xff] %vm898_vm1, %v1757_v63 }
 0xb68   : > { %v1764_v0 = vld [vmem:[#allocation2] sm:$0xff] }
 0xb69   : > { %1766 = vst.msk [vmem:[#allocation12] sm:$0xff] %vm898_vm1, %v1764_v0 }
 0xb6e   : > { %v1765_v1 = vld [vmem:[#allocation2 + $0x8] sm:$0xff] }
 0xb6f   : > { %1767 = vst.msk [vmem:[#allocation12 + $0x8] sm:$0xff] %vm898_vm1, %v1765_v1 }
 0xb70 PF: > { %p2146_p4 = scmp.eq.s32.totalorder %s2684_s27, 1  ;;  %s3141_s13 = sld [smem:[#allocation37_spill]] }
 0xb71   : > { %s2567_s7 = smov [#allocation12]   ;;  %s2568_s30 = smov 128  }
 0xb72   : > { %s1776_s9 = sshll.u32 %s2567_s7, 4  ;;  %s2569_s24 = smov 8   ;;  %s1777_s9 = int_to_ptr.vmem [resolvable:$true] %s1776_s9 }
 0xb76   : > { %s1778_s18 = sshll.u32 %s3141_s13, 4  ;;  %s1779_s18 = int_to_ptr.hbm [resolvable:$true] %s1778_s18 }
 0xb77   : > { %2118 = dma.vmem_to_hbm [thread:$0]  (%p2146_p4), %s1777_s9, 256, %s1779_s18, [#allocation5], %s2568_s30, %s2568_s30, %s2569_s24  }
 0xb78   : > { %2521 = dma.done.wait (%p2146_p4), [#allocation5], 256  }
 0xb79   : > { %2523 = vsyncadd (%p2146_p4), [#allocation5], 4294967040 }
 0xb7a PF: > { %s3142_s0 = sld [smem:[#allocation19_spill]]  ;;  %s3147_s21 = smov %s2530_s22 }
 0xb7b   : > { %s3143_s17 = sld [smem:[#allocation17_spill]] }
 0xb7c   : > { %s3144_s23 = sld [smem:[#allocation21_spill]] }
 0xb7d   : > { %s3145_s24 = sld [smem:[#allocation18_spill]] }
 0xb7e   : > { %s3146_s25 = sld [smem:[#allocation20_spill]] }
 0xb80   : > { %s29_s26 = sadd.s32 1, %s3142_s0  }
 0xb81   : > { %p26_p5 = scmp.ge.s32.totalorder %s29_s26, 4   ;;  %s3148_s22 = smov %s3143_s17 }
 0xb83   :  { %28 = sbr.rel (!%p26_p5) target bundleno = 22 (0x16), region = 202 }
 0xb88   :  { %1795 = vsyncpa [#allocation4], 1 }
 0xb89   :  { %1797 = vsyncpa [#allocation4 + $0x1], 1 }
 0xb8a   :  { %1798 = vsyncpa [#allocation7], 1 }
 0xb8b   :  { %1799 = vsyncpa [#allocation5], 1 }
 0xb8c   :  { %1801 = vsyncpa [#allocation5 + $0x1], 1 }

</bundles_post_ra>
